<compile_context>
chip_gen: v7x
topology: tpu7x:2x2x1
jax: 0.10.0
libtpu: 0.0.40
codegen_flags: <defaults>
</compile_context>

<pallas_src>
import functools

import jax
import jax.numpy as jnp
from jax.experimental import pallas as pl
from jax.experimental.pallas import tpu as pltpu

LEAKY_SLOPE = 0.1
BN_EPS = 1e-5


def _class_block_kernel(pooled_ref, w1_ref, vec_ref, w2_ref, out_ref):
    """One grid step == `S` pyramid slices (S ClassBlocks) applied to pre-pooled features."""
    S = pooled_ref.shape[0]       # slices handled by this grid step
    nb = w1_ref.shape[-1]         # bottleneck width (128)
    ncp = w2_ref.shape[-1]        # lane-padded classifier width (128)

    for s in range(S):            # small static unroll (S == 1 or 2)
        # Activations are tiny; cast THEM to bf16 so both matmuls run the native bf16 MXU path
        # (weights stay bf16 as stored -- no 262K-element widening).
        pooled = pooled_ref[s].astype(jnp.bfloat16)                   # [B, C] bf16
        w1 = w1_ref[s]                                                # [C, nb] bf16
        w2 = w2_ref[s]                                                # [nb, ncp] bf16
        vecs = vec_ref[s]                                             # [3, width] f32
        gamma, beta = vecs[0:1, :nb], vecs[1:2, :nb]
        b2 = vecs[2:3, :ncp]

        # --- ClassBlock.add_block: Linear(2048 -> bottleneck) ---
        # b1 omitted: exactly cancelled by the training-mode BN mean subtraction below.
        y = jnp.dot(pooled, w1, preferred_element_type=jnp.float32)   # [B, nb] f32 accum

        # --- BatchNorm1d (training-mode batch statistics, biased variance, eps=1e-5) ---
        mu = jnp.mean(y, axis=0, keepdims=True)
        var = jnp.mean((y - mu) ** 2, axis=0, keepdims=True)
        scale = gamma * jax.lax.rsqrt(var + BN_EPS)                   # gamma folded into scale
        y = (y - mu) * scale + beta

        # --- LeakyReLU(0.1) ---  (Dropout skipped: droprate=False in the constructor)
        y = jnp.where(y > 0, y, LEAKY_SLOPE * y)

        # --- classifier: Linear(bottleneck -> 128-padded num_classes), bf16 MXU, f32 accum ---
        out = jnp.dot(y.astype(jnp.bfloat16), w2,
                      preferred_element_type=jnp.float32) + b2
        out_ref[:, s * ncp:(s + 1) * ncp] = out


def pyramidal_block_v2(x_nchw, w1, vecs, w2, *, level, cur_level, num_classes,
                       slices_per_step=2):
    B, C, H, W = x_nchw.shape
    n_slices = level + 1 - cur_level
    assert w1.shape[0] == n_slices
    nb = w1.shape[-1]
    ncp = w2.shape[-1]
    assert C % 128 == 0 and nb % 128 == 0 and ncp % 128 == 0

    # Single pass over x: mean over W once, then reconstruct every overlapping H-slice's pooled
    # value with a tiny [n_slices, H] averaging matrix (avg_pool2d(full kernel) + squeeze).
    row_means = jnp.mean(x_nchw, axis=3)                              # [B, C, H]
    avg_rows = []
    for i in range(n_slices):
        start = int(i * H / level)
        end = int(i * H / level + cur_level * H / level - 1)
        wgt = 1.0 / float(end - start)
        avg_rows.append([wgt if start <= h < end else 0.0 for h in range(H)])
    avg_mat = jnp.asarray(avg_rows, jnp.float32)                      # [n_slices, H]
    pooled = jnp.einsum("nh,bch->nbc", avg_mat, row_means)            # [n_slices, B, C] f32
    # (At production batch sizes, store `pooled` in bf16 as well to halve its DMA / VMEM.)

    S = slices_per_step if n_slices % slices_per_step == 0 else 1
    out = pl.pallas_call(
        _class_block_kernel,
        out_shape=jax.ShapeDtypeStruct((B, n_slices * ncp), jnp.float32),
        grid=(n_slices // S,),
        in_specs=[
            pl.BlockSpec((S, B, C), lambda i: (i, 0, 0)),             # pooled slices (f32)
            pl.BlockSpec((S, C, nb), lambda i: (i, 0, 0)),            # w1 (bf16)
            pl.BlockSpec((S, 3, vecs.shape[-1]), lambda i: (i, 0, 0)),  # packed gamma/beta/b2
            pl.BlockSpec((S, nb, ncp), lambda i: (i, 0, 0)),          # w2 (bf16, lane-padded)
        ],
        out_specs=pl.BlockSpec((B, S * ncp), lambda i: (0, i)),       # lane-dense S*128-wide block
        compiler_params=pltpu.CompilerParams(dimension_semantics=("parallel",)),
    )(pooled, w1, vecs, w2)

    # Crop the lane padding; layout already matches torch.cat(all_part, dim=1).
    return out.reshape(B, n_slices, ncp)[:, :, :num_classes].reshape(B, n_slices * num_classes)


def init_params(key, n_slices, in_dim, bottleneck, num_classes):
    """weights_init_kaiming / weights_init_classifier: Linear weight ~ N(0, 0.001), bias 0;
    BatchNorm1d keeps default weight=1, bias=0."""
    k1, k2 = jax.random.split(key)
    return {
        "w1": 0.001 * jax.random.normal(k1, (n_slices, in_dim, bottleneck), jnp.float32),
        "b1": jnp.zeros((n_slices, bottleneck), jnp.float32),
        "gamma": jnp.ones((n_slices, bottleneck), jnp.float32),
        "beta": jnp.zeros((n_slices, bottleneck), jnp.float32),
        "w2": 0.001 * jax.random.normal(k2, (n_slices, bottleneck, num_classes), jnp.float32),
        "b2": jnp.zeros((n_slices, num_classes), jnp.float32),
    }


def pack_params(params, *, lane=128):
    """Kernel-side packing (storage-only transforms):
       * w1/w2 cast to bf16 (halves HBM weight bytes; fed directly to the bf16 MXU path)
       * classifier columns zero-padded num_classes -> multiple of 128 (lane-dense)
       * gamma / beta / b2 fused into one (n_slices, 3, width) f32 array (single DMA).
       b1 is intentionally NOT packed: training-mode BN cancels it exactly (see kernel note)."""
    w1_f32, w2_f32 = params["w1"], params["w2"]
    n_slices, nb, nc = w2_f32.shape
    ncp = ((nc + lane - 1) // lane) * lane
    w2_pad = jnp.zeros((n_slices, nb, ncp), jnp.float32).at[:, :, :nc].set(w2_f32)
    width = max(nb, ncp)
    vecs = jnp.zeros((n_slices, 3, width), jnp.float32)
    vecs = vecs.at[:, 0, :nb].set(params["gamma"])
    vecs = vecs.at[:, 1, :nb].set(params["beta"])
    vecs = vecs.at[:, 2, :nc].set(params["b2"])
    return {
        "w1": w1_f32.astype(jnp.bfloat16),
        "w2": w2_pad.astype(jnp.bfloat16),
        "vecs": vecs,
    }


def reference(x_nchw, w1, b1, gamma, beta, w2, b2, *, level, cur_level, mxu_bf16=True):
    """Pure-JAX mirror of the PyTorch forward (for correctness checking).
    With mxu_bf16=True the matmul inputs are rounded to bf16 exactly like the kernel's MXU feed,
    so the check isolates kernel correctness from the (intentional) bf16 quantization."""
    _, _, H, _ = x_nchw.shape
    outs = []
    for i in range(level + 1 - cur_level):
        start = int(i * H / level)
        end = int(i * H / level + cur_level * H / level - 1)
        pooled = jnp.mean(x_nchw[:, :, start:end, :], axis=(2, 3))   # avg_pool2d(full kernel)+squeeze
        if mxu_bf16:
            pooled = pooled.astype(jnp.bfloat16).astype(jnp.float32)
        y = pooled @ w1[i] + b1[i]
        mu = jnp.mean(y, axis=0, keepdims=True)
        var = jnp.mean((y - mu) ** 2, axis=0, keepdims=True)
        y = (y - mu) / jnp.sqrt(var + BN_EPS)
        y = y * gamma[i] + beta[i]
        y = jnp.where(y > 0, y, LEAKY_SLOPE * y)
        if mxu_bf16:
            y = y.astype(jnp.bfloat16).astype(jnp.float32)
        outs.append(y @ w2[i] + b2[i])
    return jnp.concatenate(outs, axis=1)


if __name__ == "__main__":
    LEVEL, CUR_LEVEL = 6, 3            # -> 4 pyramid slices, each spanning 3/6 of H (minus 1 row)
    B, C, H, W = 2, 2048, 12, 4        # C=2048 is fixed by ClassBlock(2048, ...)
    BOTTLENECK, NUM_CLASSES = 128, 100
    n_slices = LEVEL + 1 - CUR_LEVEL

    key = jax.random.PRNGKey(0)
    kx, kp = jax.random.split(key)
    x = jax.random.normal(kx, (B, C, H, W), jnp.float32)    # PyTorch-style NCHW input

    params = init_params(kp, n_slices, C, BOTTLENECK, NUM_CLASSES)
    kparams = pack_params(params)

    fwd = jax.jit(functools.partial(pyramidal_block_v2, level=LEVEL,
                                    cur_level=CUR_LEVEL, num_classes=NUM_CLASSES))
    out = jax.block_until_ready(fwd(x, kparams["w1"], kparams["vecs"], kparams["w2"]))

    # Reference uses the same bf16-rounded weight VALUES and bf16-rounded matmul activations the
    # kernel consumes (storage/MXU-feed quantization only), so the check isolates kernel correctness.
    w1_deq = kparams["w1"].astype(jnp.float32)
    w2_deq = kparams["w2"][:, :, :NUM_CLASSES].astype(jnp.float32)
    ref = reference(x, w1_deq, params["b1"], params["gamma"], params["beta"],
                    w2_deq, params["b2"], level=LEVEL, cur_level=CUR_LEVEL, mxu_bf16=True)

    assert out.shape == (B, n_slices * NUM_CLASSES), out.shape
    assert bool(jnp.allclose(out, ref, atol=1e-3, rtol=2e-2)), "Pallas output mismatches JAX reference"
    print("KERNEL_OK")
</pallas_src>

<mosaic_0001>
module attributes {stable_mosaic.version = 11 : i64} {
  func.func @_class_block_kernel(%arg0: i32, %arg1: memref<2x2x2048xf32, #tpu.memory_space<vmem>>, %arg2: memref<2x2048x128xbf16, #tpu.memory_space<vmem>>, %arg3: memref<2x3x128xf32, #tpu.memory_space<vmem>>, %arg4: memref<2x128x128xbf16, #tpu.memory_space<vmem>>, %arg5: memref<2x256xf32, #tpu.memory_space<vmem>>) attributes {dimension_semantics = [#tpu.dimension_semantics<parallel>], iteration_bounds = array<i64: 2>, scalar_prefetch = 0 : i64, scratch_operands = 0 : i64, tpu.core_type = #tpu.core_type<tc>, window_params = [{transform_indices = @transform_0, window_bounds = array<i64: 2, 2, 2048>}, {transform_indices = @transform_1, window_bounds = array<i64: 2, 2048, 128>}, {transform_indices = @transform_2, window_bounds = array<i64: 2, 3, 128>}, {transform_indices = @transform_3, window_bounds = array<i64: 2, 128, 128>}, {transform_indices = @transform_4, window_bounds = array<i64: 2, 256>}]} {
    %c0 = arith.constant 0 : index
    %c0_0 = arith.constant 0 : index
    %c0_1 = arith.constant 0 : index
    %0 = vector.load %arg1[%c0, %c0_0, %c0_1] : memref<2x2x2048xf32, #tpu.memory_space<vmem>>, vector<1x2x2048xf32>
    %1 = vector.shape_cast %0 : vector<1x2x2048xf32> to vector<2x2048xf32>
    %2 = arith.truncf %1 : vector<2x2048xf32> to vector<2x2048xbf16>
    %c0_2 = arith.constant 0 : index
    %c0_3 = arith.constant 0 : index
    %c0_4 = arith.constant 0 : index
    %3 = vector.load %arg2[%c0_2, %c0_3, %c0_4] : memref<2x2048x128xbf16, #tpu.memory_space<vmem>>, vector<1x2048x128xbf16>
    %4 = vector.shape_cast %3 : vector<1x2048x128xbf16> to vector<2048x128xbf16>
    %c0_5 = arith.constant 0 : index
    %c0_6 = arith.constant 0 : index
    %c0_7 = arith.constant 0 : index
    %5 = vector.load %arg4[%c0_5, %c0_6, %c0_7] : memref<2x128x128xbf16, #tpu.memory_space<vmem>>, vector<1x128x128xbf16>
    %6 = vector.shape_cast %5 : vector<1x128x128xbf16> to vector<128x128xbf16>
    %c0_8 = arith.constant 0 : index
    %c0_9 = arith.constant 0 : index
    %c0_10 = arith.constant 0 : index
    %7 = vector.load %arg3[%c0_8, %c0_9, %c0_10] : memref<2x3x128xf32, #tpu.memory_space<vmem>>, vector<1x3x128xf32>
    %8 = vector.shape_cast %7 : vector<1x3x128xf32> to vector<3x128xf32>
    %9 = vector.extract_strided_slice %8 {offsets = [0, 0], sizes = [1, 128], strides = [1, 1]} : vector<3x128xf32> to vector<1x128xf32>
    %10 = vector.extract_strided_slice %8 {offsets = [1, 0], sizes = [1, 128], strides = [1, 1]} : vector<3x128xf32> to vector<1x128xf32>
    %11 = vector.extract_strided_slice %8 {offsets = [2, 0], sizes = [1, 128], strides = [1, 1]} : vector<3x128xf32> to vector<1x128xf32>
    %cst = arith.constant dense<0.000000e+00> : vector<2x128xf32>
    %12 = tpu.matmul %2, %4, %cst {dimension_numbers = #tpu.dot_dimension_numbers<[1], [0], [0], [1], [0, 0, 1, 1], [], []>} : vector<2x2048xbf16>, vector<2048x128xbf16>, vector<2x128xf32> -> vector<2x128xf32>
    %cst_11 = arith.constant dense<0.000000e+00> : vector<128xf32>
    %13 = vector.multi_reduction <add>, %12, %cst_11 [0] : vector<2x128xf32> to vector<128xf32>
    %14 = vector.shape_cast %13 : vector<128xf32> to vector<1x128xf32>
    %cst_12 = arith.constant 2.000000e+00 : f32
    %15 = vector.broadcast %cst_12 : f32 to vector<1x128xf32>
    %16 = arith.divf %14, %15 : vector<1x128xf32>
    %17 = vector.broadcast %16 : vector<1x128xf32> to vector<2x128xf32>
    %18 = arith.subf %12, %17 : vector<2x128xf32>
    %19 = arith.mulf %18, %18 : vector<2x128xf32>
    %cst_13 = arith.constant dense<0.000000e+00> : vector<128xf32>
    %20 = vector.multi_reduction <add>, %19, %cst_13 [0] : vector<2x128xf32> to vector<128xf32>
    %21 = vector.shape_cast %20 : vector<128xf32> to vector<1x128xf32>
    %cst_14 = arith.constant 2.000000e+00 : f32
    %22 = vector.broadcast %cst_14 : f32 to vector<1x128xf32>
    %23 = arith.divf %21, %22 : vector<1x128xf32>
    %cst_15 = arith.constant 9.99999974E-6 : f32
    %24 = vector.broadcast %cst_15 : f32 to vector<1x128xf32>
    %25 = arith.addf %23, %24 : vector<1x128xf32>
    %26 = math.rsqrt %25 : vector<1x128xf32>
    %27 = arith.mulf %9, %26 : vector<1x128xf32>
    %28 = vector.broadcast %16 : vector<1x128xf32> to vector<2x128xf32>
    %29 = arith.subf %12, %28 : vector<2x128xf32>
    %30 = vector.broadcast %27 : vector<1x128xf32> to vector<2x128xf32>
    %31 = arith.mulf %29, %30 : vector<2x128xf32>
    %32 = vector.broadcast %10 : vector<1x128xf32> to vector<2x128xf32>
    %33 = arith.addf %31, %32 : vector<2x128xf32>
    %cst_16 = arith.constant 0.000000e+00 : f32
    %34 = vector.broadcast %cst_16 : f32 to vector<2x128xf32>
    %35 = arith.cmpf ogt, %33, %34 : vector<2x128xf32>
    %cst_17 = arith.constant 1.000000e-01 : f32
    %36 = vector.broadcast %cst_17 : f32 to vector<2x128xf32>
    %37 = arith.mulf %36, %33 : vector<2x128xf32>
    %38 = arith.select %35, %33, %37 : vector<2x128xi1>, vector<2x128xf32>
    %39 = arith.truncf %38 : vector<2x128xf32> to vector<2x128xbf16>
    %cst_18 = arith.constant dense<0.000000e+00> : vector<2x128xf32>
    %40 = tpu.matmul %39, %6, %cst_18 {dimension_numbers = #tpu.dot_dimension_numbers<[1], [0], [0], [1], [0, 0, 1, 1], [], []>} : vector<2x128xbf16>, vector<128x128xbf16>, vector<2x128xf32> -> vector<2x128xf32>
    %41 = vector.broadcast %11 : vector<1x128xf32> to vector<2x128xf32>
    %42 = arith.addf %40, %41 : vector<2x128xf32>
    %c0_19 = arith.constant 0 : index
    %c0_20 = arith.constant 0 : index
    %43 = vector.load %arg5[%c0_19, %c0_20] : memref<2x256xf32, #tpu.memory_space<vmem>>, vector<2x128xf32>
    tpu.vector_store %arg5[%c0_19, %c0_20], %42 {strides = array<i32>} : memref<2x256xf32, #tpu.memory_space<vmem>>, vector<2x128xf32>,
    %c1 = arith.constant 1 : index
    %c0_21 = arith.constant 0 : index
    %c0_22 = arith.constant 0 : index
    %44 = vector.load %arg1[%c1, %c0_21, %c0_22] : memref<2x2x2048xf32, #tpu.memory_space<vmem>>, vector<1x2x2048xf32>
    %45 = vector.shape_cast %44 : vector<1x2x2048xf32> to vector<2x2048xf32>
    %46 = arith.truncf %45 : vector<2x2048xf32> to vector<2x2048xbf16>
    %c1_23 = arith.constant 1 : index
    %c0_24 = arith.constant 0 : index
    %c0_25 = arith.constant 0 : index
    %47 = vector.load %arg2[%c1_23, %c0_24, %c0_25] : memref<2x2048x128xbf16, #tpu.memory_space<vmem>>, vector<1x2048x128xbf16>
    %48 = vector.shape_cast %47 : vector<1x2048x128xbf16> to vector<2048x128xbf16>
    %c1_26 = arith.constant 1 : index
    %c0_27 = arith.constant 0 : index
    %c0_28 = arith.constant 0 : index
    %49 = vector.load %arg4[%c1_26, %c0_27, %c0_28] : memref<2x128x128xbf16, #tpu.memory_space<vmem>>, vector<1x128x128xbf16>
    %50 = vector.shape_cast %49 : vector<1x128x128xbf16> to vector<128x128xbf16>
    %c1_29 = arith.constant 1 : index
    %c0_30 = arith.constant 0 : index
    %c0_31 = arith.constant 0 : index
    %51 = vector.load %arg3[%c1_29, %c0_30, %c0_31] : memref<2x3x128xf32, #tpu.memory_space<vmem>>, vector<1x3x128xf32>
    %52 = vector.shape_cast %51 : vector<1x3x128xf32> to vector<3x128xf32>
    %53 = vector.extract_strided_slice %52 {offsets = [0, 0], sizes = [1, 128], strides = [1, 1]} : vector<3x128xf32> to vector<1x128xf32>
    %54 = vector.extract_strided_slice %52 {offsets = [1, 0], sizes = [1, 128], strides = [1, 1]} : vector<3x128xf32> to vector<1x128xf32>
    %55 = vector.extract_strided_slice %52 {offsets = [2, 0], sizes = [1, 128], strides = [1, 1]} : vector<3x128xf32> to vector<1x128xf32>
    %cst_32 = arith.constant dense<0.000000e+00> : vector<2x128xf32>
    %56 = tpu.matmul %46, %48, %cst_32 {dimension_numbers = #tpu.dot_dimension_numbers<[1], [0], [0], [1], [0, 0, 1, 1], [], []>} : vector<2x2048xbf16>, vector<2048x128xbf16>, vector<2x128xf32> -> vector<2x128xf32>
    %cst_33 = arith.constant dense<0.000000e+00> : vector<128xf32>
    %57 = vector.multi_reduction <add>, %56, %cst_33 [0] : vector<2x128xf32> to vector<128xf32>
    %58 = vector.shape_cast %57 : vector<128xf32> to vector<1x128xf32>
    %cst_34 = arith.constant 2.000000e+00 : f32
    %59 = vector.broadcast %cst_34 : f32 to vector<1x128xf32>
    %60 = arith.divf %58, %59 : vector<1x128xf32>
    %61 = vector.broadcast %60 : vector<1x128xf32> to vector<2x128xf32>
    %62 = arith.subf %56, %61 : vector<2x128xf32>
    %63 = arith.mulf %62, %62 : vector<2x128xf32>
    %cst_35 = arith.constant dense<0.000000e+00> : vector<128xf32>
    %64 = vector.multi_reduction <add>, %63, %cst_35 [0] : vector<2x128xf32> to vector<128xf32>
    %65 = vector.shape_cast %64 : vector<128xf32> to vector<1x128xf32>
    %cst_36 = arith.constant 2.000000e+00 : f32
    %66 = vector.broadcast %cst_36 : f32 to vector<1x128xf32>
    %67 = arith.divf %65, %66 : vector<1x128xf32>
    %cst_37 = arith.constant 9.99999974E-6 : f32
    %68 = vector.broadcast %cst_37 : f32 to vector<1x128xf32>
    %69 = arith.addf %67, %68 : vector<1x128xf32>
    %70 = math.rsqrt %69 : vector<1x128xf32>
    %71 = arith.mulf %53, %70 : vector<1x128xf32>
    %72 = vector.broadcast %60 : vector<1x128xf32> to vector<2x128xf32>
    %73 = arith.subf %56, %72 : vector<2x128xf32>
    %74 = vector.broadcast %71 : vector<1x128xf32> to vector<2x128xf32>
    %75 = arith.mulf %73, %74 : vector<2x128xf32>
    %76 = vector.broadcast %54 : vector<1x128xf32> to vector<2x128xf32>
    %77 = arith.addf %75, %76 : vector<2x128xf32>
    %cst_38 = arith.constant 0.000000e+00 : f32
    %78 = vector.broadcast %cst_38 : f32 to vector<2x128xf32>
    %79 = arith.cmpf ogt, %77, %78 : vector<2x128xf32>
    %cst_39 = arith.constant 1.000000e-01 : f32
    %80 = vector.broadcast %cst_39 : f32 to vector<2x128xf32>
    %81 = arith.mulf %80, %77 : vector<2x128xf32>
    %82 = arith.select %79, %77, %81 : vector<2x128xi1>, vector<2x128xf32>
    %83 = arith.truncf %82 : vector<2x128xf32> to vector<2x128xbf16>
    %cst_40 = arith.constant dense<0.000000e+00> : vector<2x128xf32>
    %84 = tpu.matmul %83, %50, %cst_40 {dimension_numbers = #tpu.dot_dimension_numbers<[1], [0], [0], [1], [0, 0, 1, 1], [], []>} : vector<2x128xbf16>, vector<128x128xbf16>, vector<2x128xf32> -> vector<2x128xf32>
    %85 = vector.broadcast %55 : vector<1x128xf32> to vector<2x128xf32>
    %86 = arith.addf %84, %85 : vector<2x128xf32>
    %c0_41 = arith.constant 0 : index
    %c128 = arith.constant 128 : index
    %87 = vector.load %arg5[%c0_41, %c128] : memref<2x256xf32, #tpu.memory_space<vmem>>, vector<2x128xf32>
    tpu.vector_store %arg5[%c0_41, %c128], %86 {strides = array<i32>} : memref<2x256xf32, #tpu.memory_space<vmem>>, vector<2x128xf32>,
    return
  }
  func.func @transform_0(%arg0: i32) -> (i32, i32, i32) {
    %c0_i32 = arith.constant 0 : i32
    %c0_i32_0 = arith.constant 0 : i32
    %c0_i32_1 = arith.constant 0 : i32
    return %arg0, %c0_i32, %c0_i32_0 : i32, i32, i32
  }
  func.func @transform_1(%arg0: i32) -> (i32, i32, i32) {
    %c0_i32 = arith.constant 0 : i32
    %c0_i32_0 = arith.constant 0 : i32
    %c0_i32_1 = arith.constant 0 : i32
    return %arg0, %c0_i32, %c0_i32_0 : i32, i32, i32
  }
  func.func @transform_2(%arg0: i32) -> (i32, i32, i32) {
    %c0_i32 = arith.constant 0 : i32
    %c0_i32_0 = arith.constant 0 : i32
    %c0_i32_1 = arith.constant 0 : i32
    return %arg0, %c0_i32, %c0_i32_0 : i32, i32, i32
  }
  func.func @transform_3(%arg0: i32) -> (i32, i32, i32) {
    %c0_i32 = arith.constant 0 : i32
    %c0_i32_0 = arith.constant 0 : i32
    %c0_i32_1 = arith.constant 0 : i32
    return %arg0, %c0_i32, %c0_i32_0 : i32, i32, i32
  }
  func.func @transform_4(%arg0: i32) -> (i32, i32) {
    %c0_i32 = arith.constant 0 : i32
    %c0_i32_0 = arith.constant 0 : i32
    return %c0_i32, %arg0 : i32, i32
  }
}

</mosaic_0001>

<bundles_post_ra>
// kernel: pyramidal_block_v2.1
= control target key start
LH: loop header
LB: loop body
LE: loop exit
PB: predicated region body
PF: predicated region fallthrough
CT: control target
= control target key end

     0   :  { %9 = vsyncpa [#allocation3], 0  ;;  %s5635_s0 = inlined_call_operand.vmem [shape: f32[4,2,2048], index: 0, kind: input, shape index: {}]   ;;  %s5636_s1 = inlined_call_operand.hbm [shape: bf16[4,2048,128], index: 1, kind: input, shape index: {}]   ;;  %s5637_s2 = inlined_call_operand.vmem [shape: f32[4,3,128], index: 2, kind: input, shape index: {}]   ;;  %s5638_s3 = inlined_call_operand.hbm [shape: bf16[4,128,128], index: 3, kind: input, shape index: {}]   ;;  %s5639_s4 = inlined_call_operand.vmem [shape: f32[2,512], index: 4, kind: output, shape index: {}]  }
   0x1   :  { %11 = vsyncpa [#allocation3 + $0x1], 0 }
   0x2   :  { %12 = vsyncpa [#allocation5], 0 }
   0x3   :  { %14 = vsyncpa [#allocation5 + $0x1], 0  ;;  %s5078_s15 = smov 0   ;;  %s5080_s16 = smov 0  }
   0x4   :  { %s5082_s17 = smov 0   ;;  %s5084_s18 = smov 0  }
   0x5 LB: > { %s3625_s19 = sadd.s32 4294967295, %s5044_s18   ;;  %s5098_s20 = sadd.s32 1, %s5044_s18   ;;  %s5044_s18 = sphi %s5084_s18, %s5649_s18   ;;  %s5040_s17 = sphi %s5082_s17, %s5648_s17   ;;  %s5036_s16 = sphi %s5080_s16, %s5647_s16   ;;  %s5032_s15 = sphi %s5078_s15, %s5646_s15  }
   0x6   : > { %s50_s21 = ssub.s32 %s5044_s18, %s5098_s20  ;;  %s53_s22 = sadd.s32 1, %s5040_s17 }
   0x7   : > { %p51_p0 = scmp.eq.s32.totalorder %s50_s21, 0  ;;  %p60_p1 = scmp.ne.s32.totalorder %s5040_s17, %s5036_s16 }
   0x8   : > { %p61_p2 = scmp.eq.s32.totalorder %s5044_s18, 0  ;;  %p66_p3 = scmp.ne.s32.totalorder %s5036_s16, %s5032_s15 }
   0x9   : > { %s5108_s23 = scalar_select %p51_p0, %s5040_s17, %s53_s22  }
   0xa   : > { %p62_p4 = por %p61_p2, %p60_p1  ;;  %p67_p5 = scmp.eq.s32.totalorder %s3625_s19, 0 }
   0xb   : > { %p4624_p6 = scmp.lt.s32.totalorder %s5044_s18, 2  ;;  %s5118_s25 = sand.u32 1, %s5040_s17  }
   0xc   : > { %p5113_p7 = por %p67_p5, %p66_p3  ;;  %s3629_s26 = sshll.u32 %s5118_s25, 11 }
   0xd   : > { %s4199_s27 = sshll.u32 %s5044_s18, 15  ;;  %s182_s5 = scalar_lea.vmem [#allocation2], %s3629_s26 }
   0xe   : > { %s5641_s24 = scalar_select %p5113_p7, 1, 0 }
   0xf   : > { %s5125_s30 = scalar_lea.hbm %s5636_s1, %s4199_s27  ;;  %s190_s6 = sshll.u32 %s182_s5, 4  ;;  %s5127_s6 = int_to_ptr.vmem [resolvable:$true] %s190_s6 }
  0x10   : > { %p5129_p8 = pnand %p4624_p6, %p62_p4  ;;  %s179_s8 = scalar_lea.sflag [#allocation3], %s5118_s25 }
  0x11   : > { %s4946_s9 = scalar_lea.hbm %s5125_s30, 32768  ;;  %s4951_s12 = scalar_lea.hbm %s5636_s1, 65536 }
  0x12   : > { %p4947_p10 = scmp.ne.s32.totalorder %s5125_s30, %s4946_s9  ;;  %p4948_p11 = pneg %p5129_p8 }
  0x13   : > { %p4952_p0 = scmp.lt.u32.totalorder %s5125_s30, %s5636_s1  ;;  %p4953_p1 = scmp.lt.u32.totalorder %s4951_s12, %s4946_s9 }
  0x14   : > { %p4949_p12 = pnand %p4948_p11, %p4947_p10  ;;  %p4955_p3 = scmp.lt.u32.totalorder %s4946_s9, %s5125_s30 }
  0x15   : > { %p4954_p2 = por %p4953_p1, %p4952_p0 }
  0x16   : > { %p4950_p13 = pneg %p4949_p12 }
  0x17   : > { %p4956_p4 = por %p4955_p3, %p4954_p2 }
  0x19   : > { %p4957_p5 = pnand %p4956_p4, %p4950_p13 }
  0x1b   : > { %4960 = shalt.err (!%p4957_p5)
}
  0x1c   : > { %s4961_s15 = scalar_lea.vmem %s5127_s6, 32768  ;;  %s5046_s21 = smov [#allocation2]  }
  0x1d   : > { %p4962_p6 = scmp.ne.s32.totalorder %s5127_s6, %s4961_s15  ;;  %s4966_s22 = sshll.u32 %s5046_s21, 4  ;;  %s4967_s22 = int_to_ptr.vmem [resolvable:$false] %s4966_s22 }
  0x1e   : > { %s4968_s26 = scalar_lea.vmem %s4967_s22, 65536  ;;  %p4969_p9 = scmp.lt.s32.totalorder %s5127_s6, %s4967_s22 }
  0x1f   : > { %p4964_p10 = pnand %p4962_p6, %p4948_p11  ;;  %p4970_p0 = scmp.lt.s32.totalorder %s4968_s26, %s4961_s15 }
  0x21   : > { %p4965_p12 = pneg %p4964_p10  ;;  %p4971_p1 = por %p4970_p0, %p4969_p9 }
  0x23   : > { %p4972_p2 = pnand %p4971_p1, %p4965_p12 }
  0x25   : > { %4975 = shalt.err (!%p4972_p2)
}
  0x26   : > { %s5047_s27 = smov 64   ;;  %s5048_s28 = smov 4  }
  0x27   : > { %4620 = dma.hbm_to_vmem [thread:$0]  (!%p5129_p8), %s5125_s30, 32768, %s5127_s6, %s179_s8, %s5047_s27, %s5047_s27, %s5048_s28  }
  0x28   : > { %p229_p9 = scmp.lt.s32.totalorder %s5044_s18, 3  ;;  %s3633_s29 = sshll.u32 %s5118_s25, 7 }
  0x29   : > { %s4201_s5 = sshll.u32 %s5044_s18, 11  ;;  %p5643_p13 = scmp.ge.s32.totalorder %s5044_s18, 1 }
  0x2a   : > { %s5177_s12 = scalar_lea.hbm %s5638_s3, %s4201_s5  ;;  %s213_s13 = scalar_lea.vmem [#allocation4], %s3633_s29 }
  0x2b   : > { %p5170_p3 = pnand %p5643_p13, %p229_p9  ;;  %s221_s14 = sshll.u32 %s213_s13, 4  ;;  %s5179_s14 = int_to_ptr.vmem [resolvable:$true] %s221_s14 }
  0x2c   : > { %s210_s30 = scalar_lea.sflag [#allocation5], %s5118_s25  ;;  %s4976_s6 = scalar_lea.hbm %s5177_s12, 2048 }
  0x2d   : > { %p4977_p4 = scmp.ne.s32.totalorder %s5177_s12, %s4976_s6  ;;  %s4981_s21 = scalar_lea.hbm %s5638_s3, 4096 }
  0x2e   : > { %p4982_p10 = scmp.lt.u32.totalorder %s5177_s12, %s5638_s3  ;;  %p4983_p12 = scmp.lt.u32.totalorder %s4981_s21, %s4976_s6 }
  0x2f   : > { %p4979_p5 = pnand %p4977_p4, %p4948_p11  ;;  %p4985_p1 = scmp.lt.u32.totalorder %s4976_s6, %s5177_s12 }
  0x30   : > { %p4984_p0 = por %p4983_p12, %p4982_p10 }
  0x31   : > { %p4980_p6 = pneg %p4979_p5 }
  0x32   : > { %p4986_p2 = por %p4985_p1, %p4984_p0 }
  0x34   : > { %p4987_p9 = pnand %p4986_p2, %p4980_p6 }
  0x36   : > { %4990 = shalt.err (!%p4987_p9)
}
  0x37   : > { %s4991_s29 = scalar_lea.vmem %s5179_s14, 2048  ;;  %s5049_s5 = smov [#allocation4]  }
  0x38   : > { %p4992_p13 = scmp.ne.s32.totalorder %s5179_s14, %s4991_s29  ;;  %s4996_s10 = sshll.u32 %s5049_s5, 4  ;;  %s4997_s10 = int_to_ptr.vmem [resolvable:$false] %s4996_s10 }
  0x39   : > { %s4998_s11 = scalar_lea.vmem %s4997_s10, 4096  ;;  %p4999_p7 = scmp.lt.s32.totalorder %s5179_s14, %s4997_s10 }
  0x3a   : > { %p4994_p4 = pnand %p4992_p13, %p4948_p11  ;;  %p5000_p10 = scmp.lt.s32.totalorder %s4998_s11, %s4991_s29 }
  0x3c   : > { %p4995_p5 = pneg %p4994_p4  ;;  %p5001_p12 = por %p5000_p10, %p4999_p7 }
  0x3e   : > { %p5002_p0 = pnand %p5001_p12, %p4995_p5 }
  0x40   : > { %5005 = shalt.err (!%p5002_p0)
}
  0x41   : > { %4623 = dma.hbm_to_vmem [thread:$0]  (!%p5129_p8), %s5177_s12, 2048, %s5179_s14, %s210_s30, %s5047_s27, %s5047_s27, %s5048_s28  }
  0x42   : > { %233 = sbr.rel (%p5170_p3) target bundleno = 1106 (0x452), region = 36  ;;  %s235_s13 = sand.u32 (!%p5170_p3), 1, %s5036_s16  }
  0x43   : > { %s3638_s6 = sshll.u32 (!%p5170_p3), %s235_s13, 11  ;;  %s236_s8 = scalar_lea.sflag (!%p5170_p3), [#allocation3], %s235_s13 }
  0x44   : > { %s5213_s15 = scalar_lea.vmem (!%p5170_p3), [#allocation2], %s3638_s6  ;;  %p5645_p7 = scmp.ne.s32.totalorder (!%p5170_p3), %s5641_s24, 0 }
  0x49   : > { %5023 = dma.done.wait (%p5645_p7), %s236_s8, 32768  }
  0x4a   : > { %5025 = vsyncadd (%p5645_p7), %s236_s8, 4294934528  ;;  %s3639_s25 = sshll.u32 %s235_s13, 7  ;;  %s245_s7 = scalar_lea.sflag [#allocation5], %s235_s13 }
  0x4b   : > { %s5219_s21 = scalar_lea.vmem [#allocation4], %s3639_s25 }
  0x4c   : > { %5027 = dma.done.wait (%p5645_p7), %s245_s7, 2048  }
  0x4d   : > { %5029 = vsyncadd (%p5645_p7), %s245_s7, 4294965248  ;;  %v4662_v0 = vld [vmem:[%s5213_s15 + $0x40] sm:$0xff]   ;;  %v4666_v4 = vld [vmem:[%s5213_s15 + $0x48] sm:$0xff]   ;;  %s3640_s24 = sshll.u32 %s3625_s19, 1  ;;  %v5050_v22 = vmov 1983009808   ;;  %v323_v24 = vlaneseq }
  0x4e   : > { %v4663_v1 = vld [vmem:[%s5213_s15 + $0xc0] sm:$0xff]   ;;  %4203 = vmatprep.subr.bf16.mxu0 %v4662_v0  ;;  %v4667_v5 = vld [vmem:[%s5213_s15 + $0xc8] sm:$0xff]   ;;  %v4670_v8 = vld [vmem:[%s5213_s15 + $0x50] sm:$0xff]   ;;  %p290_p8 = scmp.lt.s32.totalorder %s3640_s24, 3  ;;  %v321_v23 = vunpack.c.l.s4 %v5050_v22  ;;  %vm5052_vm0 = vmmov 0   ;;  %vm1780_vm1 = vcmask 1041408  }
  0x4f   : > { %v4664_v2 = vld [vmem:[%s5213_s15] sm:$0xff]   ;;  %4225 = vmatprep.subr.bf16.mxu1 %v4663_v1  ;;  %v4668_v6 = vld [vmem:[%s5213_s15 + $0x8] sm:$0xff]   ;;  %v4671_v9 = vld [vmem:[%s5213_s15 + $0xd0] sm:$0xff]   ;;  %v5255_v30 = vshrl.u32 %v323_v24, 7 }
  0x50   : > { %v4665_v3 = vld [vmem:[%s5213_s15 + $0x80] sm:$0xff]   ;;  %4204 = vmatpush3.bf16.msra.mxu0 %v4664_v2  ;;  %v4669_v7 = vld [vmem:[%s5213_s15 + $0x88] sm:$0xff]   ;;  %v4672_v10 = vld [vmem:[%s5213_s15 + $0x10] sm:$0xff]   ;;  %s5651_s24 = smov (!%p290_p8, %s3640_s24), 3  ;;  %v322_v29 = vunpack.c.0.s8 %v321_v23 }
  0x51   : > { %4226 = vmatpush3.bf16.msra.mxu1 %v4665_v3  ;;  %4205 = vmatprep.subr.bf16.mxu0 %v4666_v4  ;;  %v4673_v11 = vld [vmem:[%s5213_s15 + $0x90] sm:$0xff]   ;;  %v4674_v12 = vld [vmem:[%s5213_s15 + $0x58] sm:$0xff]   ;;  %v4678_v16 = vld [vmem:[%s5213_s15 + $0x60] sm:$0xff]   ;;  %s4202_s18 = sshll.u32 %s5651_s24, 5  ;;  %s3644_s9 = sshll.u32 %s5651_s24, 2 }
  0x52   : > { %4227 = vmatprep.subr.bf16.mxu1 %v4667_v5  ;;  %v4675_v13 = vld [vmem:[%s5213_s15 + $0xd8] sm:$0xff]   ;;  %v4679_v17 = vld [vmem:[%s5213_s15 + $0xe0] sm:$0xff]   ;;  %v4682_v20 = vld [vmem:[%s5213_s15 + $0x68] sm:$0xff]   ;;  %s5265_s28 = scalar_lea.vmem %s5635_s0, %s4202_s18  ;;  %v5268_v35 = vsub.s32 %v322_v29, %v5255_v30  ;;  %s5495_s30 = scalar_lea.vmem %s5637_s2, %s3644_s9 }
  0x53   : > { %v4676_v14 = vld [vmem:[%s5213_s15 + $0x18] sm:$0xff]   ;;  %v4680_v18 = vld [vmem:[%s5213_s15 + $0x20] sm:$0xff]   ;;  %v4683_v21 = vld [vmem:[%s5213_s15 + $0xe8] sm:$0xff]   ;;  %s3646_s22 = sshll.u32 %s5651_s24, 1 }
  0x54   : > { %4206 = vmatpush3.bf16.msra.mxu0 %v4668_v6  ;;  %v4677_v15 = vld [vmem:[%s5213_s15 + $0x98] sm:$0xff]   ;;  %v4681_v19 = vld [vmem:[%s5213_s15 + $0xa0] sm:$0xff]   ;;  %v4684_v25 = vld [vmem:[%s5213_s15 + $0x28] sm:$0xff]   ;;  %s5593_s5 = scalar_lea.vmem %s5639_s4, %s3646_s22 }
  0x55   : > { %4228 = vmatpush3.bf16.msra.mxu1 %v4669_v7  ;;  %4207 = vmatprep.subr.bf16.mxu0 %v4670_v8  ;;  %v4685_v26 = vld [vmem:[%s5213_s15 + $0xa8] sm:$0xff]   ;;  %v4686_v27 = vld [vmem:[%s5213_s15 + $0x70] sm:$0xff]   ;;  %v4690_v33 = vld [vmem:[%s5213_s15 + $0x78] sm:$0xff]  }
  0x56   : > { %4229 = vmatprep.subr.bf16.mxu1 %v4671_v9  ;;  %v4687_v28 = vld [vmem:[%s5213_s15 + $0xf0] sm:$0xff]   ;;  %v4691_v34 = vld [vmem:[%s5213_s15 + $0xf8] sm:$0xff]   ;;  %v311_v38 = vld [vmem:[%s5265_s28] sm:$0xff] }
  0x57   : > { %v4688_v31 = vld [vmem:[%s5213_s15 + $0x30] sm:$0xff]   ;;  %v4692_v36 = vld [vmem:[%s5213_s15 + $0x38] sm:$0xff]   ;;  %v326_v39 = vrot.slane %v311_v38, %v5268_v35  ;;  %v319_v40 = vcombine.high %v311_v38, %v311_v38  ;;  %v4695_v41 = vld [vmem:[%s5213_s15 + $0x140] sm:$0xff]  }
  0x58   : > { %4208 = vmatpush3.bf16.msra.mxu0 %v4672_v10  ;;  %v4689_v32 = vld [vmem:[%s5213_s15 + $0xb0] sm:$0xff]   ;;  %v4693_v37 = vld [vmem:[%s5213_s15 + $0xb8] sm:$0xff]   ;;  %v4696_v42 = vld [vmem:[%s5213_s15 + $0x1c0] sm:$0xff]  }
  0x59   : > { %4230 = vmatpush3.bf16.msra.mxu1 %v4673_v11  ;;  %4209 = vmatprep.subr.bf16.mxu0 %v4674_v12  ;;  %v334_v43 = vcombine.high %v326_v39, %v326_v39  ;;  %v333_v44 = vrot.slane %v319_v40, %v5268_v35  ;;  %v403_v45 = vpack.c.bf16 %v326_v39, %v326_v39  ;;  %v4697_v46 = vld [vmem:[%s5213_s15 + $0x100] sm:$0xff]   ;;  %v4699_v51 = vld [vmem:[%s5213_s15 + $0x148] sm:$0xff]   ;;  %v4703_v56 = vld [vmem:[%s5213_s15 + $0x150] sm:$0xff]  }
  0x5a   : > { %4231 = vmatprep.subr.bf16.mxu1 %v4675_v13  ;;  %v4698_v49 = vld [vmem:[%s5213_s15 + $0x180] sm:$0xff]   ;;  %v4700_v53 = vld [vmem:[%s5213_s15 + $0x1c8] sm:$0xff]   ;;  %v4704_v57 = vld [vmem:[%s5213_s15 + $0x1d0] sm:$0xff]  }
  0x5b   : > { %v404_v47 = vpack.c.bf16 %v334_v43, %v334_v43  ;;  %v335_v48 = vcombine.high %v333_v44, %v333_v44  ;;  %v405_v50 = vpack.c.bf16 %v333_v44, %v333_v44  ;;  %v4701_v54 = vld [vmem:[%s5213_s15 + $0x108] sm:$0xff]   ;;  %v4705_v58 = vld [vmem:[%s5213_s15 + $0x110] sm:$0xff]   ;;  %v4707_v60 = vld [vmem:[%s5213_s15 + $0x158] sm:$0xff]  }
  0x5c   : > { %4210 = vmatpush3.bf16.msra.mxu0 %v4676_v14  ;;  %v4702_v55 = vld [vmem:[%s5213_s15 + $0x188] sm:$0xff]   ;;  %v4706_v59 = vld [vmem:[%s5213_s15 + $0x190] sm:$0xff]   ;;  %v4708_v61 = vld [vmem:[%s5213_s15 + $0x1d8] sm:$0xff]  }
  0x5d   : > { %4232 = vmatpush3.bf16.msra.mxu1 %v4677_v15  ;;  %4211 = vmatprep.subr.bf16.mxu0 %v4678_v16  ;;  %v406_v52 = vpack.c.bf16 %v335_v48, %v335_v48  ;;  %v4709_v62 = vld [vmem:[%s5213_s15 + $0x118] sm:$0xff]   ;;  %v4711_v0 = vld [vmem:[%s5213_s15 + $0x160] sm:$0xff]   ;;  %v4715_v4 = vld [vmem:[%s5213_s15 + $0x168] sm:$0xff]  }
  0x5e   : > { %4233 = vmatprep.subr.bf16.mxu1 %v4679_v17  ;;  %1492 = vmatprep.mubr.bf16.mxu0 %v404_v47  ;;  %v4710_v63 = vld [vmem:[%s5213_s15 + $0x198] sm:$0xff]   ;;  %v4712_v1 = vld [vmem:[%s5213_s15 + $0x1e0] sm:$0xff]   ;;  %v4716_v5 = vld [vmem:[%s5213_s15 + $0x1e8] sm:$0xff]  }
  0x5f   : > { %1532 = vmatprep.mubr.bf16.mxu1 %v406_v52  ;;  %v4713_v2 = vld [vmem:[%s5213_s15 + $0x120] sm:$0xff]   ;;  %v4717_v6 = vld [vmem:[%s5213_s15 + $0x128] sm:$0xff]   ;;  %v4719_v8 = vld [vmem:[%s5213_s15 + $0x170] sm:$0xff]  }
  0x60   : > { %4212 = vmatpush3.bf16.msra.mxu0 %v4680_v18  ;;  %v4714_v3 = vld [vmem:[%s5213_s15 + $0x1a0] sm:$0xff]   ;;  %v4718_v7 = vld [vmem:[%s5213_s15 + $0x1a8] sm:$0xff]   ;;  %v4720_v9 = vld [vmem:[%s5213_s15 + $0x1f0] sm:$0xff]  }
  0x61   : > { %4234 = vmatpush3.bf16.msra.mxu1 %v4681_v19  ;;  %4213 = vmatprep.subr.bf16.mxu0 %v4682_v20  ;;  %v4721_v10 = vld [vmem:[%s5213_s15 + $0x130] sm:$0xff]   ;;  %v4723_v12 = vld [vmem:[%s5213_s15 + $0x178] sm:$0xff]   ;;  %v312_v15 = vld [vmem:[%s5265_s28 + $0x8] sm:$0xff] }
  0x62   : > { %4235 = vmatprep.subr.bf16.mxu1 %v4683_v21  ;;  %v4722_v11 = vld [vmem:[%s5213_s15 + $0x1b0] sm:$0xff]   ;;  %v4724_v13 = vld [vmem:[%s5213_s15 + $0x1f8] sm:$0xff]   ;;  %v343_v17 = vrot.slane %v312_v15, %v5268_v35  ;;  %v336_v18 = vcombine.high %v312_v15, %v312_v15  ;;  %v4728_v19 = vld [vmem:[%s5213_s15 + $0x240] sm:$0xff]  }
  0x63   : > { %v4725_v14 = vld [vmem:[%s5213_s15 + $0x138] sm:$0xff]   ;;  %v4729_v22 = vld [vmem:[%s5213_s15 + $0x2c0] sm:$0xff]   ;;  %v4732_v29 = vld [vmem:[%s5213_s15 + $0x248] sm:$0xff]  }
  0x64   : > { %4214 = vmatpush3.bf16.msra.mxu0 %v4684_v25  ;;  %v4726_v16 = vld [vmem:[%s5213_s15 + $0x1b8] sm:$0xff]   ;;  %v351_v20 = vcombine.high %v343_v17, %v343_v17  ;;  %v350_v21 = vrot.slane %v336_v18, %v5268_v35  ;;  %v407_v23 = vpack.c.bf16 %v343_v17, %v343_v17  ;;  %v4730_v24 = vld [vmem:[%s5213_s15 + $0x200] sm:$0xff]   ;;  %v4738_v38 = vld [vmem:[%s5213_s15 + $0x210] sm:$0xff]  }
  0x65   : > { %4236 = vmatpush3.bf16.msra.mxu1 %v4685_v26  ;;  %4215 = vmatprep.subr.bf16.mxu0 %v4686_v27  ;;  %v4731_v27 = vld [vmem:[%s5213_s15 + $0x280] sm:$0xff]   ;;  %v4739_v39 = vld [vmem:[%s5213_s15 + $0x290] sm:$0xff]   ;;  %v4740_v40 = vld [vmem:[%s5213_s15 + $0x258] sm:$0xff]  }
  0x66   : > { %4237 = vmatprep.subr.bf16.mxu1 %v4687_v28  ;;  %v408_v25 = vpack.c.bf16 %v351_v20, %v351_v20  ;;  %v352_v26 = vcombine.high %v350_v21, %v350_v21  ;;  %v409_v28 = vpack.c.bf16 %v350_v21, %v350_v21  ;;  %v4743_v43 = vld [vmem:[%s5213_s15 + $0x298] sm:$0xff]   ;;  %v4744_v44 = vld [vmem:[%s5213_s15 + $0x260] sm:$0xff]   ;;  %v4748_v48 = vld [vmem:[%s5213_s15 + $0x268] sm:$0xff]  }
  0x67   : > { %v4747_v47 = vld [vmem:[%s5213_s15 + $0x2a0] sm:$0xff]   ;;  %v4752_v52 = vld [vmem:[%s5213_s15 + $0x270] sm:$0xff]   ;;  %v4773_v18 = vld [vmem:[%s5213_s15 + $0x358] sm:$0xff]  }
  0x68   : > { %4216 = vmatpush3.bf16.msra.mxu0 %v4688_v31  ;;  %v410_v31 = vpack.c.bf16 %v352_v26, %v352_v26  ;;  %v4770_v15 = vld [vmem:[%s5213_s15 + $0x3d0] sm:$0xff]   ;;  %v4775_v20 = vld [vmem:[%s5213_s15 + $0x318] sm:$0xff]   ;;  %v4781_v26 = vld [vmem:[%s5213_s15 + $0x368] sm:$0xff]  }
  0x69   : > { %4238 = vmatpush3.bf16.msra.mxu1 %v4689_v32  ;;  %4217 = vmatprep.subr.bf16.mxu0 %v4690_v33  ;;  %v4733_v32 = vld [vmem:[%s5213_s15 + $0x2c8] sm:$0xff]   ;;  %v4772_v17 = vld [vmem:[%s5213_s15 + $0x390] sm:$0xff]   ;;  %v4776_v21 = vld [vmem:[%s5213_s15 + $0x398] sm:$0xff]  }
  0x6a   : > { %4239 = vmatprep.subr.bf16.mxu1 %v4691_v34  ;;  %v4734_v33 = vld [vmem:[%s5213_s15 + $0x208] sm:$0xff]  }
  0x6b   : > { %v4735_v34 = vld [vmem:[%s5213_s15 + $0x288] sm:$0xff]  }
  0x6c   : > { %4218 = vmatpush3.bf16.msra.mxu0 %v4692_v36  ;;  %v4736_v36 = vld [vmem:[%s5213_s15 + $0x250] sm:$0xff]  }
  0x6d   : > { %4240 = vmatpush3.bf16.msra.mxu1 %v4693_v37  ;;  %4247 = vmatprep.subr.bf16.mxu0 %v4695_v41  ;;  %v4737_v37 = vld [vmem:[%s5213_s15 + $0x2d0] sm:$0xff]   ;;  %v4741_v41 = vld [vmem:[%s5213_s15 + $0x2d8] sm:$0xff]  }
  0x6e   : > { %4269 = vmatprep.subr.bf16.mxu1 %v4696_v42  ;;  %v4742_v42 = vld [vmem:[%s5213_s15 + $0x218] sm:$0xff]  }
  0x6f   : > { %1493 = vmatmul.mubr.bf16.vlgmr.msra.gmra.mrb[0].mxu0 %v403_v45  ;;  %v4745_v45 = vld [vmem:[%s5213_s15 + $0x2e0] sm:$0xff]  }
  0x70   : > { %4248 = vmatpush3.bf16.msra.mxu0 %v4697_v46  ;;  %1533 = vmatmul.mubr.bf16.vlgmr.msra.gmra.mrb[0].mxu1 %v405_v50  ;;  %v4746_v46 = vld [vmem:[%s5213_s15 + $0x220] sm:$0xff]   ;;  %v4750_v50 = vld [vmem:[%s5213_s15 + $0x228] sm:$0xff]  }
  0x71   : > { %4249 = vmatprep.subr.bf16.mxu0 %v4699_v51  ;;  %4270 = vmatpush3.bf16.msra.mxu1 %v4698_v49  ;;  %v4749_v49 = vld [vmem:[%s5213_s15 + $0x2e8] sm:$0xff]  }
  0x72   : > { %4271 = vmatprep.subr.bf16.mxu1 %v4700_v53  ;;  %1572 = vmatprep.mubr.bf16.mxu0 %v408_v25  ;;  %v4751_v51 = vld [vmem:[%s5213_s15 + $0x2a8] sm:$0xff]   ;;  %v4753_v53 = vld [vmem:[%s5213_s15 + $0x2f0] sm:$0xff]   ;;  %v4780_v25 = vld [vmem:[%s5213_s15 + $0x3a0] sm:$0xff]  }
  0x73   : > { %1612 = vmatprep.mubr.bf16.mxu1 %v410_v31  ;;  %v4785_v31 = vld [vmem:[%s5213_s15 + $0x370] sm:$0xff]  }
  0x74   : > { %4250 = vmatpush3.bf16.msra.mxu0 %v4701_v54  ;;  %v4754_v54 = vld [vmem:[%s5213_s15 + $0x230] sm:$0xff]  }
  0x75   : > { %4251 = vmatprep.subr.bf16.mxu0 %v4703_v56  ;;  %4272 = vmatpush3.bf16.msra.mxu1 %v4702_v55  ;;  %v4755_v55 = vld [vmem:[%s5213_s15 + $0x2b0] sm:$0xff]   ;;  %v4756_v56 = vld [vmem:[%s5213_s15 + $0x278] sm:$0xff]  }
  0x76   : > { %4273 = vmatprep.subr.bf16.mxu1 %v4704_v57  ;;  %v4757_v57 = vld [vmem:[%s5213_s15 + $0x2f8] sm:$0xff]  }
  0x78   : > { %4252 = vmatpush3.bf16.msra.mxu0 %v4705_v58  ;;  %v4758_v58 = vld [vmem:[%s5213_s15 + $0x238] sm:$0xff]  }
  0x79   : > { %4253 = vmatprep.subr.bf16.mxu0 %v4707_v60  ;;  %4274 = vmatpush3.bf16.msra.mxu1 %v4706_v59  ;;  %v313_v59 = vld [vmem:[%s5265_s28 + $0x10] sm:$0xff]  ;;  %v4759_v60 = vld [vmem:[%s5213_s15 + $0x2b8] sm:$0xff]  }
  0x7a   : > { %4275 = vmatprep.subr.bf16.mxu1 %v4708_v61  ;;  %v360_v61 = vrot.slane %v313_v59, %v5268_v35 }
  0x7c   : > { %4254 = vmatpush3.bf16.msra.mxu0 %v4709_v62  ;;  %v353_v62 = vcombine.high %v313_v59, %v313_v59 }
  0x7d   : > { %4255 = vmatprep.subr.bf16.mxu0 %v4711_v0  ;;  %4276 = vmatpush3.bf16.msra.mxu1 %v4710_v63  ;;  %v4761_v63 = vld [vmem:[%s5213_s15 + $0x340] sm:$0xff]   ;;  %v368_v0 = vcombine.high %v360_v61, %v360_v61 }
  0x7e   : > { %4277 = vmatprep.subr.bf16.mxu1 %v4712_v1  ;;  %v367_v1 = vrot.slane %v353_v62, %v5268_v35  ;;  %v5051_v62 = vmov 0.0  }
  0x80   : > { %4256 = vmatpush3.bf16.msra.mxu0 %v4713_v2  ;;  %v4762_v2 = vld [vmem:[%s5213_s15 + $0x3c0] sm:$0xff]  }
  0x81   : > { %4257 = vmatprep.subr.bf16.mxu0 %v4715_v4  ;;  %4278 = vmatpush3.bf16.msra.mxu1 %v4714_v3  ;;  %v411_v3 = vpack.c.bf16 %v360_v61, %v360_v61  ;;  %v4763_v4 = vld [vmem:[%s5213_s15 + $0x300] sm:$0xff]  }
  0x82   : > { %4279 = vmatprep.subr.bf16.mxu1 %v4716_v5  ;;  %v412_v5 = vpack.c.bf16 %v368_v0, %v368_v0  ;;  %v4796_v0 = vld [vmem:[%s5213_s15 + $0x400] sm:$0xff]  }
  0x84   : > { %4258 = vmatpush3.bf16.msra.mxu0 %v4717_v6  ;;  %v369_v6 = vcombine.high %v367_v1, %v367_v1 }
  0x85   : > { %4259 = vmatprep.subr.bf16.mxu0 %v4719_v8  ;;  %4280 = vmatpush3.bf16.msra.mxu1 %v4718_v7  ;;  %v4764_v7 = vld [vmem:[%s5213_s15 + $0x380] sm:$0xff]   ;;  %v413_v8 = vpack.c.bf16 %v367_v1, %v367_v1  ;;  %v4797_v1 = vld [vmem:[%s5219_s21 + $0x8] sm:$0xff]  }
  0x86   : > { %4281 = vmatprep.subr.bf16.mxu1 %v4720_v9  ;;  %v4765_v9 = vld [vmem:[%s5213_s15 + $0x348] sm:$0xff]  }
  0x88   : > { %4260 = vmatpush3.bf16.msra.mxu0 %v4721_v10  ;;  %v414_v10 = vpack.c.bf16 %v369_v6, %v369_v6  ;;  %v4802_v6 = vld [vmem:[%s5213_s15 + $0x410] sm:$0xff]  }
  0x89   : > { %4261 = vmatprep.subr.bf16.mxu0 %v4723_v12  ;;  %4282 = vmatpush3.bf16.msra.mxu1 %v4722_v11  ;;  %v4766_v11 = vld [vmem:[%s5213_s15 + $0x3c8] sm:$0xff]  }
  0x8a   : > { %4283 = vmatprep.subr.bf16.mxu1 %v4724_v13  ;;  %v4767_v12 = vld [vmem:[%s5213_s15 + $0x308] sm:$0xff]  }
  0x8b   : > { %v4768_v13 = vld [vmem:[%s5213_s15 + $0x388] sm:$0xff]  }
  0x8c   : > { %4262 = vmatpush3.bf16.msra.mxu0 %v4725_v14  ;;  %v4769_v14 = vld [vmem:[%s5213_s15 + $0x350] sm:$0xff]  }
  0x8d   : > { %4291 = vmatprep.subr.bf16.mxu0 %v4728_v19  ;;  %4284 = vmatpush3.bf16.msra.mxu1 %v4726_v16  ;;  %v4771_v16 = vld [vmem:[%s5213_s15 + $0x310] sm:$0xff]   ;;  %v4774_v19 = vld [vmem:[%s5213_s15 + $0x3d8] sm:$0xff]  }
  0x8e   : > { %4313 = vmatprep.subr.bf16.mxu1 %v4729_v22  ;;  %v4777_v22 = vld [vmem:[%s5213_s15 + $0x360] sm:$0xff]  }
  0x8f   : > { %1573 = vmatmul.mubr.bf16.vlgmr.msra.gmra.mrb[4].mxu0 %v407_v23  ;;  %v4778_v23 = vld [vmem:[%s5213_s15 + $0x3e0] sm:$0xff]  }
  0x90   : > { %4292 = vmatpush3.bf16.msra.mxu0 %v4730_v24  ;;  %1613 = vmatmul.mubr.bf16.vlgmr.msra.gmra.mrb[4].mxu1 %v409_v28  ;;  %v4779_v24 = vld [vmem:[%s5213_s15 + $0x320] sm:$0xff]   ;;  %v4783_v28 = vld [vmem:[%s5213_s15 + $0x328] sm:$0xff]  }
  0x91   : > { %4293 = vmatprep.subr.bf16.mxu0 %v4732_v29  ;;  %4314 = vmatpush3.bf16.msra.mxu1 %v4731_v27  ;;  %v4782_v27 = vld [vmem:[%s5213_s15 + $0x3e8] sm:$0xff]  }
  0x92   : > { %4315 = vmatprep.subr.bf16.mxu1 %v4733_v32  ;;  %1652 = vmatprep.mubr.bf16.mxu0 %v412_v5  ;;  %v4784_v29 = vld [vmem:[%s5213_s15 + $0x3a8] sm:$0xff]   ;;  %v4786_v32 = vld [vmem:[%s5213_s15 + $0x3f0] sm:$0xff]  }
  0x93   : > { %1692 = vmatprep.mubr.bf16.mxu1 %v414_v10  ;;  %v4801_v5 = vld [vmem:[%s5213_s15 + $0x450] sm:$0xff]   ;;  %v4806_v10 = vld [vmem:[%s5219_s21 + $0x20] sm:$0xff]  }
  0x94   : > { %4294 = vmatpush3.bf16.msra.mxu0 %v4734_v33  ;;  %v4787_v33 = vld [vmem:[%s5213_s15 + $0x330] sm:$0xff]  }
  0x95   : > { %4295 = vmatprep.subr.bf16.mxu0 %v4736_v36  ;;  %4316 = vmatpush3.bf16.msra.mxu1 %v4735_v34  ;;  %v4788_v34 = vld [vmem:[%s5213_s15 + $0x3b0] sm:$0xff]   ;;  %v4789_v36 = vld [vmem:[%s5213_s15 + $0x378] sm:$0xff]  }
  0x96   : > { %4317 = vmatprep.subr.bf16.mxu1 %v4737_v37  ;;  %v4790_v37 = vld [vmem:[%s5213_s15 + $0x3f8] sm:$0xff]  }
  0x98   : > { %4296 = vmatpush3.bf16.msra.mxu0 %v4738_v38  ;;  %v4791_v38 = vld [vmem:[%s5213_s15 + $0x338] sm:$0xff]  }
  0x99   : > { %4297 = vmatprep.subr.bf16.mxu0 %v4740_v40  ;;  %4318 = vmatpush3.bf16.msra.mxu1 %v4739_v39  ;;  %v4792_v39 = vld [vmem:[%s5213_s15 + $0x3b8] sm:$0xff]  }
  0x9a   : > { %4319 = vmatprep.subr.bf16.mxu1 %v4741_v41  ;;  %v314_v40 = vld [vmem:[%s5265_s28 + $0x18] sm:$0xff] }
  0x9b   : > { %v377_v41 = vrot.slane %v314_v40, %v5268_v35 }
  0x9c   : > { %4298 = vmatpush3.bf16.msra.mxu0 %v4742_v42  ;;  %v370_v42 = vcombine.high %v314_v40, %v314_v40 }
  0x9d   : > { %4299 = vmatprep.subr.bf16.mxu0 %v4744_v44  ;;  %4320 = vmatpush3.bf16.msra.mxu1 %v4743_v43  ;;  %v385_v43 = vcombine.high %v377_v41, %v377_v41 }
  0x9e   : > { %4321 = vmatprep.subr.bf16.mxu1 %v4745_v45  ;;  %v384_v44 = vrot.slane %v370_v42, %v5268_v35  ;;  %v415_v45 = vpack.c.bf16 %v377_v41, %v377_v41  ;;  %v4820_v41 = vld [vmem:[%s5213_s15 + $0x540] sm:$0xff]  }
  0xa0   : > { %4300 = vmatpush3.bf16.msra.mxu0 %v4746_v46  ;;  %v416_v46 = vpack.c.bf16 %v385_v43, %v385_v43  ;;  %v4821_v43 = vld [vmem:[%s5213_s15 + $0x500] sm:$0xff]  }
  0xa1   : > { %4301 = vmatprep.subr.bf16.mxu0 %v4748_v48  ;;  %4322 = vmatpush3.bf16.msra.mxu1 %v4747_v47  ;;  %v386_v47 = vcombine.high %v384_v44, %v384_v44  ;;  %v417_v48 = vpack.c.bf16 %v384_v44, %v384_v44  ;;  %v4824_v44 = vld [vmem:[%s5213_s15 + $0x548] sm:$0xff]  }
  0xa2   : > { %4323 = vmatprep.subr.bf16.mxu1 %v4749_v49 }
  0xa3   : > { %v418_v49 = vpack.c.bf16 %v386_v47, %v386_v47  ;;  %v4829_v47 = vld [vmem:[%s5213_s15 + $0x510] sm:$0xff]  }
  0xa4   : > { %4302 = vmatpush3.bf16.msra.mxu0 %v4750_v50 }
  0xa5   : > { %4303 = vmatprep.subr.bf16.mxu0 %v4752_v52  ;;  %4324 = vmatpush3.bf16.msra.mxu1 %v4751_v51 }
  0xa6   : > { %4325 = vmatprep.subr.bf16.mxu1 %v4753_v53 }
  0xa8   : > { %4304 = vmatpush3.bf16.msra.mxu0 %v4754_v54 }
  0xa9   : > { %4305 = vmatprep.subr.bf16.mxu0 %v4756_v56  ;;  %4326 = vmatpush3.bf16.msra.mxu1 %v4755_v55 }
  0xaa   : > { %4327 = vmatprep.subr.bf16.mxu1 %v4757_v57 }
  0xac   : > { %4306 = vmatpush3.bf16.msra.mxu0 %v4758_v58 }
  0xad   : > { %4335 = vmatprep.subr.bf16.mxu0 %v4761_v63  ;;  %4328 = vmatpush3.bf16.msra.mxu1 %v4759_v60  ;;  %v4794_v60 = vld [vmem:[%s5219_s21] sm:$0xff]  }
  0xae   : > { %4357 = vmatprep.subr.bf16.mxu1 %v4762_v2  ;;  %v4795_v63 = vld [vmem:[%s5213_s15 + $0x440] sm:$0xff]   ;;  %v4798_v2 = vld [vmem:[%s5213_s15 + $0x448] sm:$0xff]  }
  0xaf   : > { %1653 = vmatmul.mubr.bf16.vlgmr.msra.gmra.mrb[8].mxu0 %v411_v3  ;;  %v4799_v3 = vld [vmem:[%s5213_s15 + $0x408] sm:$0xff]  }
  0xb0   : > { %4336 = vmatpush3.bf16.msra.mxu0 %v4763_v4  ;;  %1693 = vmatmul.mubr.bf16.vlgmr.msra.gmra.mrb[8].mxu1 %v413_v8  ;;  %v4800_v4 = vld [vmem:[%s5219_s21 + $0x10] sm:$0xff]   ;;  %v4804_v8 = vld [vmem:[%s5213_s15 + $0x458] sm:$0xff]  }
  0xb1   : > { %4337 = vmatprep.subr.bf16.mxu0 %v4765_v9  ;;  %4358 = vmatpush3.bf16.msra.mxu1 %v4764_v7  ;;  %v4803_v7 = vld [vmem:[%s5219_s21 + $0x18] sm:$0xff]  }
  0xb2   : > { %4359 = vmatprep.subr.bf16.mxu1 %v4766_v11  ;;  %1732 = vmatprep.mubr.bf16.mxu0 %v416_v46  ;;  %v4805_v9 = vld [vmem:[%s5213_s15 + $0x418] sm:$0xff]   ;;  %v4807_v11 = vld [vmem:[%s5213_s15 + $0x460] sm:$0xff]   ;;  %v4828_v46 = vld [vmem:[%s5213_s15 + $0x550] sm:$0xff]  }
  0xb3   : > { %1772 = vmatprep.mubr.bf16.mxu1 %v418_v49  ;;  %v4833_v49 = vld [vmem:[%s5213_s15 + $0x518] sm:$0xff]  }
  0xb4   : > { %4338 = vmatpush3.bf16.msra.mxu0 %v4767_v12  ;;  %v4808_v12 = vld [vmem:[%s5213_s15 + $0x420] sm:$0xff]  }
  0xb5   : > { %4339 = vmatprep.subr.bf16.mxu0 %v4769_v14  ;;  %4360 = vmatpush3.bf16.msra.mxu1 %v4768_v13  ;;  %v4809_v13 = vld [vmem:[%s5219_s21 + $0x28] sm:$0xff]  }
  0xb6   : > { %4361 = vmatprep.subr.bf16.mxu1 %v4770_v15  ;;  %v4810_v14 = vld [vmem:[%s5213_s15 + $0x468] sm:$0xff]  }
  0xb7   : > { %v4811_v15 = vld [vmem:[%s5213_s15 + $0x428] sm:$0xff]  }
  0xb8   : > { %4340 = vmatpush3.bf16.msra.mxu0 %v4771_v16  ;;  %v4812_v16 = vld [vmem:[%s5219_s21 + $0x30] sm:$0xff]  }
  0xb9   : > { %4341 = vmatprep.subr.bf16.mxu0 %v4773_v18  ;;  %4362 = vmatpush3.bf16.msra.mxu1 %v4772_v17  ;;  %v4813_v17 = vld [vmem:[%s5213_s15 + $0x470] sm:$0xff]  }
  0xba   : > { %4363 = vmatprep.subr.bf16.mxu1 %v4774_v19  ;;  %v4814_v18 = vld [vmem:[%s5213_s15 + $0x430] sm:$0xff]   ;;  %v4815_v19 = vld [vmem:[%s5219_s21 + $0x38] sm:$0xff]  }
  0xbc   : > { %4342 = vmatpush3.bf16.msra.mxu0 %v4775_v20  ;;  %v4816_v20 = vld [vmem:[%s5213_s15 + $0x478] sm:$0xff]  }
  0xbd   : > { %4343 = vmatprep.subr.bf16.mxu0 %v4777_v22  ;;  %4364 = vmatpush3.bf16.msra.mxu1 %v4776_v21  ;;  %v4818_v22 = vld [vmem:[%s5213_s15 + $0x4c0] sm:$0xff]  }
  0xbe   : > { %4365 = vmatprep.subr.bf16.mxu1 %v4778_v23 }
  0xc0   : > { %4344 = vmatpush3.bf16.msra.mxu0 %v4779_v24  ;;  %v4817_v24 = vld [vmem:[%s5213_s15 + $0x438] sm:$0xff]  }
  0xc1   : > { %4345 = vmatprep.subr.bf16.mxu0 %v4781_v26  ;;  %4366 = vmatpush3.bf16.msra.mxu1 %v4780_v25  ;;  %v5418_v25 = vld [vmem:[%s5265_s28 + $0x20] sm:$0xff] }
  0xc2   : > { %4367 = vmatprep.subr.bf16.mxu1 %v4782_v27 }
  0xc4   : > { %4346 = vmatpush3.bf16.msra.mxu0 %v4783_v28 }
  0xc5   : > { %4347 = vmatprep.subr.bf16.mxu0 %v4785_v31  ;;  %4368 = vmatpush3.bf16.msra.mxu1 %v4784_v29  ;;  %v1926_v29 = vrot.slane %v5418_v25, %v5268_v35 }
  0xc6   : > { %4369 = vmatprep.subr.bf16.mxu1 %v4786_v32 }
  0xc7   : > { %v2003_v42 = vpack.c.bf16 %v1926_v29, %v1926_v29 }
  0xc8   : > { %4348 = vmatpush3.bf16.msra.mxu0 %v4787_v33 }
  0xc9   : > { %4349 = vmatprep.subr.bf16.mxu0 %v4789_v36  ;;  %4370 = vmatpush3.bf16.msra.mxu1 %v4788_v34 }
  0xca   : > { %4371 = vmatprep.subr.bf16.mxu1 %v4790_v37  ;;  %v1934_v37 = vcombine.high %v1926_v29, %v1926_v29 }
  0xcc   : > { %4350 = vmatpush3.bf16.msra.mxu0 %v4791_v38  ;;  %v2004_v40 = vpack.c.bf16 %v1934_v37, %v1934_v37 }
  0xcd   : > { %4372 = vmatpush3.bf16.msra.mxu1 %v4792_v39  ;;  %4573 = vmatprep.subr.bf16.mxu0 %v5051_v62 }
  0xce   : > { %4388 = vmatprep.subr.bf16.mxu1 %v4795_v63 }
  0xcf   : > { %1733 = vmatmul.mubr.bf16.vlgmr.msra.gmra.mrb[12].mxu0 %v415_v45  ;;  %v4825_v45 = vld [vmem:[%s5213_s15 + $0x508] sm:$0xff]  }
  0xd0   : > { %1773 = vmatmul.mubr.bf16.vlgmr.msra.gmra.mrb[12].mxu1 %v417_v48  ;;  %4574 = vmatpush3.bf16.msra.mxu0 %v4794_v60  ;;  %v4832_v48 = vld [vmem:[%s5213_s15 + $0x558] sm:$0xff]  }
  0xd1   : > { %4575 = vmatprep.subr.bf16.mxu0 %v5051_v62  ;;  %4389 = vmatpush3.bf16.msra.mxu1 %v4796_v0  ;;  %v4848_v0 = vld [vmem:[%s5213_s15 + $0x578] sm:$0xff]  }
  0xd2   : > { %4390 = vmatprep.subr.bf16.mxu1 %v4798_v2  ;;  %4589 = vmatprep.mubr.msk.bf16.mxu0 %vm5052_vm0, %v5051_v62 }
  0xd3   : > { %3095 = vmatprep.mubr.bf16.mxu1 %v2004_v40 }
  0xd4   : > { %4576 = vmatpush3.bf16.msra.mxu0 %v4797_v1  ;;  %v4850_v1 = vld [vmem:[%s5213_s15 + $0x538] sm:$0xff]  }
  0xd5   : > { %4577 = vmatprep.subr.bf16.mxu0 %v5051_v62  ;;  %4391 = vmatpush3.bf16.msra.mxu1 %v4799_v3 }
  0xd6   : > { %4392 = vmatprep.subr.bf16.mxu1 %v4801_v5 }
  0xd8   : > { %4578 = vmatpush3.bf16.msra.mxu0 %v4800_v4 }
  0xd9   : > { %4579 = vmatprep.subr.bf16.mxu0 %v5051_v62  ;;  %4393 = vmatpush3.bf16.msra.mxu1 %v4802_v6 }
  0xda   : > { %4394 = vmatprep.subr.bf16.mxu1 %v4804_v8 }
  0xdc   : > { %4580 = vmatpush3.bf16.msra.mxu0 %v4803_v7 }
  0xdd   : > { %4581 = vmatprep.subr.bf16.mxu0 %v5051_v62  ;;  %4395 = vmatpush3.bf16.msra.mxu1 %v4805_v9 }
  0xde   : > { %4396 = vmatprep.subr.bf16.mxu1 %v4807_v11 }
  0xe0   : > { %4582 = vmatpush3.bf16.msra.mxu0 %v4806_v10 }
  0xe1   : > { %4583 = vmatprep.subr.bf16.mxu0 %v5051_v62  ;;  %4397 = vmatpush3.bf16.msra.mxu1 %v4808_v12  ;;  %v4853_v12 = vld [vmem:[%s5213_s15 + $0x640] sm:$0xff]  }
  0xe2   : > { %4398 = vmatprep.subr.bf16.mxu1 %v4810_v14  ;;  %v4857_v14 = vld [vmem:[%s5213_s15 + $0x648] sm:$0xff]  }
  0xe4   : > { %4584 = vmatpush3.bf16.msra.mxu0 %v4809_v13  ;;  %v4854_v13 = vld [vmem:[%s5213_s15 + $0x600] sm:$0xff]  }
  0xe5   : > { %4585 = vmatprep.subr.bf16.mxu0 %v5051_v62  ;;  %4399 = vmatpush3.bf16.msra.mxu1 %v4811_v15  ;;  %v4858_v15 = vld [vmem:[%s5213_s15 + $0x608] sm:$0xff]  }
  0xe6   : > { %4400 = vmatprep.subr.bf16.mxu1 %v4813_v17  ;;  %v4862_v17 = vld [vmem:[%s5213_s15 + $0x610] sm:$0xff]  }
  0xe8   : > { %4586 = vmatpush3.bf16.msra.mxu0 %v4812_v16  ;;  %v4861_v16 = vld [vmem:[%s5213_s15 + $0x650] sm:$0xff]  }
  0xe9   : > { %4587 = vmatprep.subr.bf16.mxu0 %v5051_v62  ;;  %4401 = vmatpush3.bf16.msra.mxu1 %v4814_v18  ;;  %v4865_v18 = vld [vmem:[%s5213_s15 + $0x658] sm:$0xff]  }
  0xea   : > { %4402 = vmatprep.subr.bf16.mxu1 %v4816_v20  ;;  %v4869_v20 = vld [vmem:[%s5213_s15 + $0x660] sm:$0xff]  }
  0xec   : > { %4588 = vmatpush3.bf16.msra.mxu0 %v4815_v19  ;;  %v4866_v19 = vld [vmem:[%s5213_s15 + $0x618] sm:$0xff]  }
  0xed   : > { %4410 = vmatprep.subr.bf16.mxu0 %v4818_v22  ;;  %4403 = vmatpush3.bf16.msra.mxu1 %v4817_v24  ;;  %v4873_v22 = vld [vmem:[%s5213_s15 + $0x668] sm:$0xff]   ;;  %v4877_v24 = vld [vmem:[%s5213_s15 + $0x670] sm:$0xff]  }
  0xee   : > { %4432 = vmatprep.subr.bf16.mxu1 %v4820_v41 }
  0xf0   : > { %3096 = vmatmul.mubr.bf16.vlgmr.msra.gmra.mrb[16].mxu1 %v2003_v42 }
  0xf1   : > { %4433 = vmatpush3.bf16.msra.mxu1 %v4821_v43 }
  0xf2   : > { %4434 = vmatprep.subr.bf16.mxu1 %v4824_v44 }
  0xf5   : > { %4435 = vmatpush3.bf16.msra.mxu1 %v4825_v45 }
  0xf6   : > { %4436 = vmatprep.subr.bf16.mxu1 %v4828_v46 }
  0xf9   : > { %4437 = vmatpush3.bf16.msra.mxu1 %v4829_v47  ;;  %v4886_v47 = vld [vmem:[%s5213_s15 + $0x740] sm:$0xff]  }
  0xfa   : > { %4438 = vmatprep.subr.bf16.mxu1 %v4832_v48  ;;  %v4887_v48 = vld [vmem:[%s5213_s15 + $0x700] sm:$0xff]  }
  0xfd   : > { %4439 = vmatpush3.bf16.msra.mxu1 %v4833_v49 }
 0x142   : > { %v4219_v50 = vpop.f32.mrb[0].mxu0 }
 0x143   : > { %v4220_v51 = vpop.f32.mrb[1].mxu0  ;;  %v4241_v52 = vpop.f32.mrb[0].mxu1 }
 0x144   : > { %v4221_v53 = vadd.f32 %v4220_v51, %v4219_v50  ;;  %v4222_v54 = vpop.f32.mrb[2].mxu0  ;;  %v4242_v55 = vpop.f32.mrb[1].mxu1  ;;  %v4836_v50 = vld [vmem:[%s5213_s15 + $0x560] sm:$0xff]  }
 0x145   : > { %v4223_v56 = vpop.f32.mrb[3].mxu0  ;;  %v4243_v57 = vadd.f32 %v4242_v55, %v4241_v52  ;;  %v4244_v58 = vpop.f32.mrb[2].mxu1  ;;  %v4837_v51 = vld [vmem:[%s5213_s15 + $0x520] sm:$0xff]   ;;  %4440 = vmatprep.subr.bf16.mxu1 %v4836_v50  ;;  %v4840_v52 = vld [vmem:[%s5213_s15 + $0x568] sm:$0xff]   ;;  %v4844_v54 = vld [vmem:[%s5213_s15 + $0x570] sm:$0xff]  }
 0x146   : > { %v4245_v59 = vpop.f32.mrb[3].mxu1  ;;  %4441 = vmatpush3.bf16.msra.mxu1 %v4837_v51  ;;  %v4845_v55 = vld [vmem:[%s5213_s15 + $0x530] sm:$0xff]  }
 0x147   : > { %v5381_v61 = vadd.f32 %v4243_v57, %v4221_v53  ;;  %v4841_v53 = vld [vmem:[%s5213_s15 + $0x528] sm:$0xff]   ;;  %4442 = vmatprep.subr.bf16.mxu1 %v4840_v52 }
 0x148   : > { %v5438_v57 = vld [vmem:[%s5265_s28 + $0x28] sm:$0xff] }
 0x149   : > { %v1943_v59 = vrot.slane %v5438_v57, %v5268_v35  ;;  %v4890_v52 = vld [vmem:[%s5213_s15 + $0x748] sm:$0xff]  }
 0x14a   : > { %4443 = vmatpush3.bf16.msra.mxu1 %v4841_v53  ;;  %v4891_v53 = vld [vmem:[%s5213_s15 + $0x708] sm:$0xff]  }
 0x14b   : > { %4444 = vmatprep.subr.bf16.mxu1 %v4844_v54  ;;  %v1951_v4 = vcombine.high %v1943_v59, %v1943_v59  ;;  %v2007_v11 = vpack.c.bf16 %v1943_v59, %v1943_v59 }
 0x14d   : > { %v2008_v9 = vpack.c.bf16 %v1951_v4, %v1951_v4 }
 0x14e   : > { %4445 = vmatpush3.bf16.msra.mxu1 %v4845_v55 }
 0x14f   : > { %4446 = vmatprep.subr.bf16.mxu1 %v4848_v0  ;;  %3175 = vmatprep.mubr.bf16.mxu1 %v2008_v9 }
 0x152   : > { %4447 = vmatpush3.bf16.msra.mxu1 %v4850_v1 }
 0x153   : > { %4476 = vmatprep.subr.bf16.mxu1 %v4853_v12 }
 0x155   : > { %3176 = vmatmul.mubr.bf16.vlgmr.msra.gmra.mrb[20].mxu1 %v2007_v11  ;;  %v4911_v11 = vld [vmem:[%s5213_s15 + $0x730] sm:$0xff]  }
 0x156   : > { %4477 = vmatpush3.bf16.msra.mxu1 %v4854_v13  ;;  %v5482_v13 = vld [vmem:[%s5265_s28 + $0x38] sm:$0xff] }
 0x157   : > { %4478 = vmatprep.subr.bf16.mxu1 %v4857_v14 }
 0x15a   : > { %4479 = vmatpush3.bf16.msra.mxu1 %v4858_v15  ;;  %v1977_v15 = vrot.slane %v5482_v13, %v5268_v35 }
 0x15b   : > { %4480 = vmatprep.subr.bf16.mxu1 %v4861_v16  ;;  %v4914_v16 = vld [vmem:[%s5213_s15 + $0x778] sm:$0xff]  }
 0x15e   : > { %4481 = vmatpush3.bf16.msra.mxu1 %v4862_v17  ;;  %v4916_v17 = vld [vmem:[%s5213_s15 + $0x738] sm:$0xff]  }
 0x15f   : > { %4482 = vmatprep.subr.bf16.mxu1 %v4865_v18 }
 0x162   : > { %v4263_v21 = vpop.f32.mrb[4].mxu0  ;;  %4483 = vmatpush3.bf16.msra.mxu1 %v4866_v19  ;;  %v1985_v19 = vcombine.high %v1977_v15, %v1977_v15 }
 0x163   : > { %v4264_v23 = vpop.f32.mrb[5].mxu0  ;;  %v4285_v26 = vpop.f32.mrb[4].mxu1  ;;  %4484 = vmatprep.subr.bf16.mxu1 %v4869_v20 }
 0x164   : > { %v4265_v27 = vadd.f32 %v4264_v23, %v4263_v21  ;;  %v4266_v28 = vpop.f32.mrb[6].mxu0  ;;  %v4286_v31 = vpop.f32.mrb[5].mxu1  ;;  %v4870_v21 = vld [vmem:[%s5213_s15 + $0x620] sm:$0xff]   ;;  %v4874_v23 = vld [vmem:[%s5213_s15 + $0x628] sm:$0xff]  }
 0x165   : > { %v4267_v32 = vpop.f32.mrb[7].mxu0  ;;  %v4287_v34 = vadd.f32 %v4286_v31, %v4285_v26  ;;  %v4288_v36 = vpop.f32.mrb[6].mxu1  ;;  %v4878_v26 = vld [vmem:[%s5213_s15 + $0x630] sm:$0xff]  }
 0x166   : > { %v1575_v33 = vadd.f32 %v4265_v27, %v5381_v61  ;;  %v4289_v38 = vpop.f32.mrb[7].mxu1  ;;  %4485 = vmatpush3.bf16.msra.mxu1 %v4870_v21  ;;  %v5459_v27 = vld [vmem:[%s5265_s28 + $0x30] sm:$0xff]  ;;  %v4881_v32 = vld [vmem:[%s5213_s15 + $0x678] sm:$0xff]   ;;  %v2016_v21 = vpack.c.bf16 %v1985_v19, %v1985_v19 }
 0x167   : > { %4486 = vmatprep.subr.bf16.mxu1 %v4873_v22  ;;  %v1960_v29 = vrot.slane %v5459_v27, %v5268_v35  ;;  %v2015_v22 = vpack.c.bf16 %v1977_v15, %v1977_v15  ;;  %v1953_v15 = vcombine.high %v5459_v27, %v5459_v27  ;;  %v4879_v19 = vld [vmem:[%s5213_s15 + $0x5f8] sm:$0xff]   ;;  %v4885_v27 = vld [vmem:[%s5213_s15 + $0x680] sm:$0xff]  }
 0x168   : > { %v1615_v39 = vadd.f32 %v4287_v34, %v1575_v33  ;;  %v4883_v33 = vld [vmem:[%s5213_s15 + $0x638] sm:$0xff]  }
 0x169   : > { %v1968_v38 = vcombine.high %v1960_v29, %v1960_v29  ;;  %v2011_v46 = vpack.c.bf16 %v1960_v29, %v1960_v29  ;;  %v1805_v29 = vsub.s32 0, %v5255_v30 }
 0x16a   : > { %4487 = vmatpush3.bf16.msra.mxu1 %v4874_v23 }
 0x16b   : > { %4488 = vmatprep.subr.bf16.mxu1 %v4877_v24  ;;  %v2012_v44 = vpack.c.bf16 %v1968_v38, %v1968_v38 }
 0x16d   : > { %3255 = vmatprep.mubr.bf16.mxu1 %v2012_v44 }
 0x16e   : > { %4489 = vmatpush3.bf16.msra.mxu1 %v4878_v26 }
 0x16f   : > { %4490 = vmatprep.subr.bf16.mxu1 %v4881_v32  ;;  %v1919_v32 = vcombine.high %v5418_v25, %v5418_v25 }
 0x171   : > { %v1933_v38 = vrot.slane %v1919_v32, %v5268_v35  ;;  %v4889_v32 = vld [vmem:[%s5213_s15 + $0x688] sm:$0xff]  }
 0x172   : > { %4491 = vmatpush3.bf16.msra.mxu1 %v4883_v33 }
 0x173   : > { %4520 = vmatprep.subr.bf16.mxu1 %v4886_v47  ;;  %v4823_v47 = vld [vmem:[%s5213_s15 + $0x488] sm:$0xff]  }
 0x175   : > { %3256 = vmatmul.mubr.bf16.vlgmr.msra.gmra.mrb[24].mxu1 %v2011_v46  ;;  %v4822_v46 = vld [vmem:[%s5213_s15 + $0x4c8] sm:$0xff]  }
 0x176   : > { %4521 = vmatpush3.bf16.msra.mxu1 %v4887_v48  ;;  %3335 = vmatprep.mubr.bf16.mxu1 %v2016_v21  ;;  %v4826_v48 = vld [vmem:[%s5213_s15 + $0x4d0] sm:$0xff]  }
 0x177   : > { %4522 = vmatprep.subr.bf16.mxu1 %v4890_v52  ;;  %v4834_v52 = vld [vmem:[%s5213_s15 + $0x4e0] sm:$0xff]  }
 0x17a   : > { %4523 = vmatpush3.bf16.msra.mxu1 %v4891_v53  ;;  %v4835_v53 = vld [vmem:[%s5213_s15 + $0x4a0] sm:$0xff]  }
 0x182   : > { %v4307_v56 = vpop.f32.mrb[8].mxu0 }
 0x183   : > { %v4308_v58 = vpop.f32.mrb[9].mxu0  ;;  %v4329_v60 = vpop.f32.mrb[8].mxu1 }
 0x184   : > { %v4309_v61 = vadd.f32 %v4308_v58, %v4307_v56  ;;  %v4310_v63 = vpop.f32.mrb[10].mxu0  ;;  %v4330_v2 = vpop.f32.mrb[9].mxu1  ;;  %v4894_v56 = vld [vmem:[%s5213_s15 + $0x750] sm:$0xff]  }
 0x185   : > { %v4311_v3 = vpop.f32.mrb[11].mxu0  ;;  %v4331_v6 = vadd.f32 %v4330_v2, %v4329_v60  ;;  %v4332_v7 = vpop.f32.mrb[10].mxu1  ;;  %v4895_v58 = vld [vmem:[%s5213_s15 + $0x710] sm:$0xff]   ;;  %4524 = vmatprep.subr.bf16.mxu1 %v4894_v56  ;;  %v4899_v63 = vld [vmem:[%s5213_s15 + $0x718] sm:$0xff]   ;;  %v4902_v2 = vld [vmem:[%s5213_s15 + $0x760] sm:$0xff]   ;;  %v1936_v56 = vcombine.high %v5438_v57, %v5438_v57 }
 0x186   : > { %v1655_v5 = vadd.f32 %v4309_v61, %v1615_v39  ;;  %v4333_v8 = vpop.f32.mrb[11].mxu1  ;;  %4525 = vmatpush3.bf16.msra.mxu1 %v4895_v58  ;;  %v4898_v61 = vld [vmem:[%s5213_s15 + $0x758] sm:$0xff]   ;;  %v4903_v3 = vld [vmem:[%s5213_s15 + $0x720] sm:$0xff]   ;;  %v4907_v7 = vld [vmem:[%s5213_s15 + $0x728] sm:$0xff]  }
 0x187   : > { %4526 = vmatprep.subr.bf16.mxu1 %v4898_v61  ;;  %v4842_v58 = vld [vmem:[%s5213_s15 + $0x4f0] sm:$0xff]   ;;  %v4846_v61 = vld [vmem:[%s5213_s15 + $0x4f8] sm:$0xff]   ;;  %v4852_v57 = vld [vmem:[%s5213_s15 + $0x580] sm:$0xff]  }
 0x188   : > { %v1695_v10 = vadd.f32 %v4331_v6, %v1655_v5  ;;  %v4906_v6 = vld [vmem:[%s5213_s15 + $0x768] sm:$0xff]  }
 0x18a   : > { %4527 = vmatpush3.bf16.msra.mxu1 %v4899_v63  ;;  %v4847_v63 = vld [vmem:[%s5213_s15 + $0x4b8] sm:$0xff]  }
 0x18b   : > { %4528 = vmatprep.subr.bf16.mxu1 %v4902_v2  ;;  %v2005_v2 = vpack.c.bf16 %v1933_v38, %v1933_v38 }
 0x18e   : > { %4529 = vmatpush3.bf16.msra.mxu1 %v4903_v3 }
 0x18f   : > { %4530 = vmatprep.subr.bf16.mxu1 %v4906_v6  ;;  %v4859_v6 = vld [vmem:[%s5213_s15 + $0x5d0] sm:$0xff]  }
 0x192   : > { %4531 = vmatpush3.bf16.msra.mxu1 %v4907_v7  ;;  %v4860_v7 = vld [vmem:[%s5213_s15 + $0x590] sm:$0xff]  }
 0x1a2   : > { %v4351_v28 = vpop.f32.mrb[12].mxu0 }
 0x1a3   : > { %v4352_v31 = vpop.f32.mrb[13].mxu0  ;;  %v4373_v34 = vpop.f32.mrb[12].mxu1 }
 0x1a4   : > { %v4353_v36 = vadd.f32 %v4352_v31, %v4351_v28  ;;  %v4354_v37 = vpop.f32.mrb[14].mxu0  ;;  %v4374_v39 = vpop.f32.mrb[13].mxu1  ;;  %v5498_v28 = vld [vmem:[%s5495_s30] sm:$0x7]  ;;  %v1810_v31 = vsub.s32 1, %v5255_v30 }
 0x1a5   : > { %v4355_v40 = vpop.f32.mrb[15].mxu0  ;;  %v4375_v42 = vadd.f32 %v4374_v39, %v4373_v34  ;;  %v4376_v43 = vpop.f32.mrb[14].mxu1 }
 0x1a6   : > { %v1735_v41 = vadd.f32 %v4353_v36, %v1695_v10  ;;  %v4377_v45 = vpop.f32.mrb[15].mxu1  ;;  %v4910_v10 = vld [vmem:[%s5213_s15 + $0x770] sm:$0xff]   ;;  %v1811_v37 = vrot.slane %v5498_v28, %v1810_v31  ;;  %v4819_v43 = vld [vmem:[%s5213_s15 + $0x480] sm:$0xff]  }
 0x1a7   : > { %4532 = vmatprep.subr.bf16.mxu1 %v4910_v10  ;;  %v4867_v10 = vld [vmem:[%s5213_s15 + $0x5e0] sm:$0xff]  }
 0x1a8   : > { %v1775_v49 = vadd.f32 %v4375_v42, %v1735_v41  ;;  %4533 = vmatpush3.bf16.msra.mxu1 %v4911_v11  ;;  %v1935_v41 = vcombine.high %v1933_v38, %v1933_v38  ;;  %v4868_v11 = vld [vmem:[%s5213_s15 + $0x5a0] sm:$0xff]  }
 0x1a9   : > { %4534 = vmatprep.subr.bf16.mxu1 %v4914_v16  ;;  %v4875_v16 = vld [vmem:[%s5213_s15 + $0x5f0] sm:$0xff]   ;;  %v4900_v38 = vld [vmem:[%s5213_s15 + $0x6e0] sm:$0xff]  }
 0x1aa   : > { %v1781_v50 = vsel %vm1780_vm1, %v1775_v49, 0.0  ;;  %v2006_v44 = vpack.c.bf16 %v1935_v41, %v1935_v41  ;;  %v4905_v41 = vld [vmem:[%s5213_s15 + $0x6a8] sm:$0xff]  }
 0x1ab   : > { %v1782_v51 = vrot.slane %v1781_v50, 4 }
 0x1ac   : > { %4535 = vmatpush3.bf16.msra.mxu1 %v4916_v17  ;;  %v4876_v17 = vld [vmem:[%s5213_s15 + $0x5b0] sm:$0xff]  }
 0x1ad   : > { %v1783_v54 = vadd.f32 %v1782_v51, %v1781_v50  ;;  %4593 = vmatprep.subr.bf16.mxu1 %v5051_v62  ;;  %v4830_v50 = vld [vmem:[%s5213_s15 + $0x4d8] sm:$0xff]  }
 0x1ae   : > { %v4831_v51 = vld [vmem:[%s5213_s15 + $0x498] sm:$0xff]  }
 0x1af   : > { %v1784_v55 = vrot.slane %v1783_v54, 2  ;;  %3336 = vmatmul.mubr.bf16.vlgmr.msra.gmra.mrb[28].mxu1 %v2015_v22  ;;  %v4884_v22 = vld [vmem:[%s5213_s15 + $0x6c0] sm:$0xff]  }
 0x1b0   : > { %4609 = vmatprep.mubr.msk.bf16.mxu1 %vm5052_vm0, %v5051_v62 }
 0x1b1   : > { %v1785_v59 = vadd.f32 %v1784_v55, %v1783_v54  ;;  %v4838_v54 = vld [vmem:[%s5213_s15 + $0x4e8] sm:$0xff]  }
 0x1b2   : > { %v4839_v55 = vld [vmem:[%s5213_s15 + $0x4a8] sm:$0xff]  }
 0x1b3   : > { %v1786_v60 = vrot.slane %v1785_v59, 1 }
 0x1b5   : > { %v1787_v0 = vadd.f32 %v1786_v60, %v1785_v59  ;;  %v4843_v59 = vld [vmem:[%s5213_s15 + $0x4b0] sm:$0xff]   ;;  %v1950_v60 = vrot.slane %v1936_v56, %v5268_v35  ;;  %v4920_v56 = vld [vmem:[%s5213_s15 + $0x788] sm:$0xff]  }
 0x1b7   : > { %v1789_v1 = vmul.f32 0.5, %v1787_v0  ;;  %v1952_v0 = vcombine.high %v1950_v60, %v1950_v60 }
 0x1b9   : > { %v1790_v4 = vsub.f32 %v1775_v49, %v1789_v1  ;;  %v4827_v49 = vld [vmem:[%s5213_s15 + $0x490] sm:$0xff]   ;;  %v4851_v1 = vld [vmem:[%s5213_s15 + $0x5c0] sm:$0xff]   ;;  %v2010_v3 = vpack.c.bf16 %v1952_v0, %v1952_v0 }
 0x1ba   : > { %v4926_v0 = vld [vmem:[%s5213_s15 + $0x7a0] sm:$0xff]  }
 0x1bb   : > { %v1791_v5 = vmul.f32 %v1790_v4, %v1790_v4 }
 0x1bd   : > { %v1792_v8 = vsel %vm1780_vm1, %v1791_v5, 0.0  ;;  %v4856_v5 = vld [vmem:[%s5213_s15 + $0x588] sm:$0xff]  }
 0x1be   : > { %v1793_v9 = vrot.slane %v1792_v8, 4 }
 0x1c0   : > { %v1794_v12 = vadd.f32 %v1793_v9, %v1792_v8  ;;  %v4863_v8 = vld [vmem:[%s5213_s15 + $0x5d8] sm:$0xff]  }
 0x1c1   : > { %v4864_v9 = vld [vmem:[%s5213_s15 + $0x598] sm:$0xff]  }
 0x1c2   : > { %v1795_v14 = vrot.slane %v1794_v12, 2 }
 0x1c4   : > { %v1796_v18 = vadd.f32 %v1795_v14, %v1794_v12  ;;  %v4871_v12 = vld [vmem:[%s5213_s15 + $0x5e8] sm:$0xff]  }
 0x1c5   : > { %v4872_v14 = vld [vmem:[%s5213_s15 + $0x5a8] sm:$0xff]  }
 0x1c6   : > { %v1797_v20 = vrot.slane %v1796_v18, 1 }
 0x1c8   : > { %v1798_v23 = vadd.f32 %v1797_v20, %v1796_v18  ;;  %v1967_v18 = vrot.slane %v1953_v15, %v5268_v35  ;;  %v4880_v20 = vld [vmem:[%s5213_s15 + $0x5b8] sm:$0xff]  }
 0x1ca   : > { %v1799_v24 = vmul.f32 0.5, %v1798_v23  ;;  %v1969_v21 = vcombine.high %v1967_v18, %v1967_v18  ;;  %v2009_v23 = vpack.c.bf16 %v1950_v60, %v1950_v60  ;;  %v4923_v60 = vld [vmem:[%s5213_s15 + $0x7d8] sm:$0xff]  }
 0x1cc   : > { %v1800_v26 = vadd.f32 1e-05, %v1799_v24  ;;  %v2014_v24 = vpack.c.bf16 %v1969_v21, %v1969_v21 }
 0x1ce   : > { %4942 = vrsqrt.f32 %v1800_v26  ;;  %v4888_v26 = vld [vmem:[%s5213_s15 + $0x6c8] sm:$0xff]  }
 0x1d8   : > { %v4943_v33 = vpop.eup %4942 }
 0x1d9   : > { %v1802_v34 = vmul.f32 %v4943_v33, %v5498_v28  ;;  %v4892_v33 = vld [vmem:[%s5213_s15 + $0x6d0] sm:$0xff]  }
 0x1db   : > { %v1806_v36 = vrot.slane %v1802_v34, %v1805_v29  ;;  %v4893_v34 = vld [vmem:[%s5213_s15 + $0x690] sm:$0xff]  }
 0x1dd   : > { %v1807_v39 = vmul.f32 %v1806_v36, %v1790_v4  ;;  %v4855_v4 = vld [vmem:[%s5213_s15 + $0x5c8] sm:$0xff]   ;;  %v4896_v36 = vld [vmem:[%s5213_s15 + $0x6d8] sm:$0xff]  }
 0x1df   : > { %v1812_v40 = vadd.f32 %v1811_v37, %v1807_v39  ;;  %v4897_v37 = vld [vmem:[%s5213_s15 + $0x698] sm:$0xff]   ;;  %v4901_v39 = vld [vmem:[%s5213_s15 + $0x6a0] sm:$0xff]  }
 0x1e1   : > { %vm1813_vm2 = vcmp.gt.f32.partialorder %v1812_v40, 0.0  ;;  %v1814_v25 = vmul.f32 0.1, %v1812_v40 }
 0x1e3   : > { %v1815_v42 = vsel %vm1813_vm2, %v1812_v40, %v1814_v25  ;;  %v4904_v40 = vld [vmem:[%s5213_s15 + $0x6e8] sm:$0xff]   ;;  %v1970_v25 = vcombine.high %v5482_v13, %v5482_v13 }
 0x1e4   : > { %v1816_v45 = vpack.c.bf16 %v1815_v42, %v1815_v42  ;;  %v4908_v42 = vld [vmem:[%s5213_s15 + $0x6f0] sm:$0xff]  }
 0x1e6   : > { %4590 = vmatmul.mubr.bf16.vlgmr.msra.gmra.mrb[16].mxu0 %v1816_v45  ;;  %v4912_v45 = vld [vmem:[%s5213_s15 + $0x6f8] sm:$0xff]  }
 0x1e7   : > { %4411 = vmatpush3.bf16.msra.mxu0 %v4819_v43  ;;  %3135 = vmatprep.mubr.bf16.mxu0 %v2006_v44  ;;  %v4909_v43 = vld [vmem:[%s5213_s15 + $0x6b0] sm:$0xff]   ;;  %v1984_v44 = vrot.slane %v1970_v25, %v5268_v35  ;;  %v4918_v35 = vld [vmem:[%s5213_s15 + $0x780] sm:$0xff]  }
 0x1e8   : > { %4412 = vmatprep.subr.bf16.mxu0 %v4822_v46  ;;  %v4404_v46 = vpop.f32.mrb[16].mxu1 }
 0x1eb   : > { %4413 = vmatpush3.bf16.msra.mxu0 %v4823_v47  ;;  %v4405_v47 = vpop.f32.mrb[17].mxu1 }
 0x1ec   : > { %4414 = vmatprep.subr.bf16.mxu0 %v4826_v48  ;;  %v4913_v48 = vld [vmem:[%s5213_s15 + $0x6b8] sm:$0xff]   ;;  %v4407_v13 = vpop.f32.mrb[18].mxu1 }
 0x1ef   : > { %4415 = vmatpush3.bf16.msra.mxu0 %v4827_v49  ;;  %v1986_v49 = vcombine.high %v1984_v44, %v1984_v44 }
 0x1f0   : > { %4416 = vmatprep.subr.bf16.mxu0 %v4830_v50  ;;  %v5567_v50 = vadd.f32 %v4405_v47, %v4404_v46  ;;  %v4939_v46 = vld [vmem:[%s5219_s21 + $0x68] sm:$0xff]   ;;  %v4940_v47 = vld [vmem:[%s5219_s21 + $0x70] sm:$0xff]  }
 0x1f3   : > { %4417 = vmatpush3.bf16.msra.mxu0 %v4831_v51  ;;  %v4917_v51 = vld [vmem:[%s5213_s15 + $0x7c0] sm:$0xff]  }
 0x1f4   : > { %4418 = vmatprep.subr.bf16.mxu0 %v4834_v52  ;;  %v4408_v52 = vpop.f32.mrb[19].mxu1 }
 0x1f7   : > { %4419 = vmatpush3.bf16.msra.mxu0 %v4835_v53  ;;  %v2013_v53 = vpack.c.bf16 %v1967_v18, %v1967_v18 }
 0x1f8   : > { %4420 = vmatprep.subr.bf16.mxu0 %v4838_v54  ;;  %v2018_v54 = vpack.c.bf16 %v1986_v49, %v1986_v49 }
 0x1fb   : > { %4421 = vmatpush3.bf16.msra.mxu0 %v4839_v55  ;;  %v4919_v55 = vld [vmem:[%s5213_s15 + $0x7c8] sm:$0xff]  }
 0x1fc   : > { %4422 = vmatprep.subr.bf16.mxu0 %v4842_v58  ;;  %v4921_v58 = vld [vmem:[%s5213_s15 + $0x7d0] sm:$0xff]  }
 0x1ff   : > { %4423 = vmatpush3.bf16.msra.mxu0 %v4843_v59  ;;  %v4922_v59 = vld [vmem:[%s5213_s15 + $0x790] sm:$0xff]  }
 0x200   : > { %4424 = vmatprep.subr.bf16.mxu0 %v4846_v61  ;;  %v4924_v61 = vld [vmem:[%s5213_s15 + $0x798] sm:$0xff]  }
 0x203   : > { %4425 = vmatpush3.bf16.msra.mxu0 %v4847_v63  ;;  %v4925_v63 = vld [vmem:[%s5213_s15 + $0x7e0] sm:$0xff]  }
 0x204   : > { %4454 = vmatprep.subr.bf16.mxu0 %v4851_v1  ;;  %v4927_v1 = vld [vmem:[%s5213_s15 + $0x7e8] sm:$0xff]  }
 0x206   : > { %3136 = vmatmul.mubr.bf16.vlgmr.msra.gmra.mrb[20].mxu0 %v2005_v2  ;;  %v4928_v2 = vld [vmem:[%s5213_s15 + $0x7a8] sm:$0xff]  }
 0x207   : > { %4455 = vmatpush3.bf16.msra.mxu0 %v4852_v57  ;;  %3215 = vmatprep.mubr.bf16.mxu0 %v2010_v3  ;;  %v4929_v57 = vld [vmem:[%s5213_s15 + $0x7f0] sm:$0xff]  }
 0x208   : > { %4456 = vmatprep.subr.bf16.mxu0 %v4855_v4  ;;  %v4930_v3 = vld [vmem:[%s5213_s15 + $0x7b0] sm:$0xff]   ;;  %v4931_v4 = vld [vmem:[%s5213_s15 + $0x7f8] sm:$0xff]  }
 0x20b   : > { %4457 = vmatpush3.bf16.msra.mxu0 %v4856_v5 }
 0x20c   : > { %4458 = vmatprep.subr.bf16.mxu0 %v4859_v6 }
 0x20f   : > { %4459 = vmatpush3.bf16.msra.mxu0 %v4860_v7  ;;  %v4932_v7 = vld [vmem:[%s5213_s15 + $0x7b8] sm:$0xff]  }
 0x210   : > { %4460 = vmatprep.subr.bf16.mxu0 %v4863_v8 }
 0x213   : > { %4461 = vmatpush3.bf16.msra.mxu0 %v4864_v9 }
 0x214   : > { %4462 = vmatprep.subr.bf16.mxu0 %v4867_v10 }
 0x217   : > { %4463 = vmatpush3.bf16.msra.mxu0 %v4868_v11  ;;  %v2017_v11 = vpack.c.bf16 %v1984_v44, %v1984_v44  ;;  %v4937_v44 = vld [vmem:[%s5219_s21 + $0x58] sm:$0xff]  }
 0x218   : > { %4464 = vmatprep.subr.bf16.mxu0 %v4871_v12 }
 0x21b   : > { %4465 = vmatpush3.bf16.msra.mxu0 %v4872_v14 }
 0x21c   : > { %4466 = vmatprep.subr.bf16.mxu0 %v4875_v16 }
 0x21f   : > { %4467 = vmatpush3.bf16.msra.mxu0 %v4876_v17 }
 0x220   : > { %4468 = vmatprep.subr.bf16.mxu0 %v4879_v19 }
 0x223   : > { %4469 = vmatpush3.bf16.msra.mxu0 %v4880_v20 }
 0x224   : > { %4498 = vmatprep.subr.bf16.mxu0 %v4884_v22 }
 0x226   : > { %3216 = vmatmul.mubr.bf16.vlgmr.msra.gmra.mrb[24].mxu0 %v2009_v23  ;;  %v1819_v23 = vsub.s32 2, %v5255_v30 }
 0x227   : > { %4499 = vmatpush3.bf16.msra.mxu0 %v4885_v27  ;;  %3295 = vmatprep.mubr.bf16.mxu0 %v2014_v24 }
 0x228   : > { %4500 = vmatprep.subr.bf16.mxu0 %v4888_v26  ;;  %v4448_v5 = vpop.f32.mrb[20].mxu1  ;;  %v1820_v27 = vrot.slane %v5498_v28, %v1819_v23  ;;  %v4934_v28 = vld [vmem:[%s5219_s21 + $0x40] sm:$0xff]  }
 0x229   : > { %v4449_v6 = vpop.f32.mrb[21].mxu1  ;;  %4594 = vmatpush3.bf16.msra.mxu1 %v4934_v28 }
 0x22a   : > { %v4450_v8 = vadd.f32 %v4449_v6, %v4448_v5  ;;  %v4451_v9 = vpop.f32.mrb[22].mxu1  ;;  %4595 = vmatprep.subr.bf16.mxu1 %v5051_v62 }
 0x22b   : > { %4501 = vmatpush3.bf16.msra.mxu0 %v4889_v32  ;;  %v4452_v10 = vpop.f32.mrb[23].mxu1 }
 0x22c   : > { %4502 = vmatprep.subr.bf16.mxu0 %v4892_v33 }
 0x22f   : > { %4503 = vmatpush3.bf16.msra.mxu0 %v4893_v34 }
 0x230   : > { %4504 = vmatprep.subr.bf16.mxu0 %v4896_v36 }
 0x233   : > { %4505 = vmatpush3.bf16.msra.mxu0 %v4897_v37 }
 0x234   : > { %4506 = vmatprep.subr.bf16.mxu0 %v4900_v38 }
 0x237   : > { %4507 = vmatpush3.bf16.msra.mxu0 %v4901_v39 }
 0x238   : > { %4508 = vmatprep.subr.bf16.mxu0 %v4904_v40 }
 0x23b   : > { %4509 = vmatpush3.bf16.msra.mxu0 %v4905_v41 }
 0x23c   : > { %4510 = vmatprep.subr.bf16.mxu0 %v4908_v42  ;;  %v4935_v42 = vld [vmem:[%s5219_s21 + $0x48] sm:$0xff]  }
 0x23d   : > { %4596 = vmatpush3.bf16.msra.mxu1 %v4935_v42 }
 0x23e   : > { %4597 = vmatprep.subr.bf16.mxu1 %v5051_v62 }
 0x23f   : > { %4511 = vmatpush3.bf16.msra.mxu0 %v4909_v43  ;;  %v4936_v43 = vld [vmem:[%s5219_s21 + $0x50] sm:$0xff]  }
 0x240   : > { %4512 = vmatprep.subr.bf16.mxu0 %v4912_v45  ;;  %v4938_v45 = vld [vmem:[%s5219_s21 + $0x60] sm:$0xff]  }
 0x241   : > { %4598 = vmatpush3.bf16.msra.mxu1 %v4936_v43 }
 0x242   : > { %4599 = vmatprep.subr.bf16.mxu1 %v5051_v62 }
 0x243   : > { %4513 = vmatpush3.bf16.msra.mxu0 %v4913_v48  ;;  %v4941_v48 = vld [vmem:[%s5219_s21 + $0x78] sm:$0xff]  }
 0x244   : > { %4542 = vmatprep.subr.bf16.mxu0 %v4917_v51 }
 0x245   : > { %4600 = vmatpush3.bf16.msra.mxu1 %v4937_v44 }
 0x246   : > { %3296 = vmatmul.mubr.bf16.vlgmr.msra.gmra.mrb[28].mxu0 %v2013_v53  ;;  %4601 = vmatprep.subr.bf16.mxu1 %v5051_v62 }
 0x247   : > { %4543 = vmatpush3.bf16.msra.mxu0 %v4918_v35  ;;  %3375 = vmatprep.mubr.bf16.mxu0 %v2018_v54 }
 0x248   : > { %4544 = vmatprep.subr.bf16.mxu0 %v4919_v55  ;;  %v4492_v12 = vpop.f32.mrb[24].mxu1 }
 0x249   : > { %v4493_v14 = vpop.f32.mrb[25].mxu1  ;;  %4602 = vmatpush3.bf16.msra.mxu1 %v4938_v45 }
 0x24a   : > { %v4494_v15 = vadd.f32 %v4493_v14, %v4492_v12  ;;  %v4495_v16 = vpop.f32.mrb[26].mxu1  ;;  %4603 = vmatprep.subr.bf16.mxu1 %v5051_v62 }
 0x24b   : > { %4545 = vmatpush3.bf16.msra.mxu0 %v4920_v56  ;;  %v4496_v17 = vpop.f32.mrb[27].mxu1 }
 0x24c   : > { %4546 = vmatprep.subr.bf16.mxu0 %v4921_v58 }
 0x24d   : > { %4604 = vmatpush3.bf16.msra.mxu1 %v4939_v46 }
 0x24e   : > { %4605 = vmatprep.subr.bf16.mxu1 %v5051_v62 }
 0x24f   : > { %4547 = vmatpush3.bf16.msra.mxu0 %v4922_v59 }
 0x250   : > { %4548 = vmatprep.subr.bf16.mxu0 %v4923_v60 }
 0x251   : > { %4606 = vmatpush3.bf16.msra.mxu1 %v4940_v47 }
 0x252   : > { %4607 = vmatprep.subr.bf16.mxu1 %v5051_v62 }
 0x253   : > { %4549 = vmatpush3.bf16.msra.mxu0 %v4924_v61 }
 0x254   : > { %4550 = vmatprep.subr.bf16.mxu0 %v4925_v63 }
 0x255   : > { %4608 = vmatpush3.bf16.msra.mxu1 %v4941_v48 }
 0x257   : > { %4551 = vmatpush3.bf16.msra.mxu0 %v4926_v0 }
 0x258   : > { %4552 = vmatprep.subr.bf16.mxu0 %v4927_v1 }
 0x25b   : > { %4553 = vmatpush3.bf16.msra.mxu0 %v4928_v2 }
 0x25c   : > { %4554 = vmatprep.subr.bf16.mxu0 %v4929_v57 }
 0x25f   : > { %4555 = vmatpush3.bf16.msra.mxu0 %v4930_v3 }
 0x260   : > { %4556 = vmatprep.subr.bf16.mxu0 %v4931_v4 }
 0x263   : > { %4557 = vmatpush3.bf16.msra.mxu0 %v4932_v7 }
 0x266   : > { %3376 = vmatmul.mubr.bf16.vlgmr.msra.gmra.mrb[32].mxu0 %v2017_v11 }
 0x282   : > { %v4536_v18 = vpop.f32.mrb[28].mxu1 }
 0x283   : > { %v4537_v19 = vpop.f32.mrb[29].mxu1 }
 0x284   : > { %v4538_v20 = vadd.f32 %v4537_v19, %v4536_v18  ;;  %v4539_v21 = vpop.f32.mrb[30].mxu1 }
 0x285   : > { %v4540_v22 = vpop.f32.mrb[31].mxu1 }
 0x2b9   : > { %v1903_v24 = vpop.f32.mrb[16].mxu0 }
 0x2ba   : > { %v1904_v26 = vadd.f32 %v1903_v24, %v1820_v27  ;;  %v4591_v32 = vpop.f32.mrb[17].mxu0  ;;  %v4059_v27 = vld [vmem:[%s5495_s30 + $0x4] sm:$0x7] }
 0x2bb   : > { %v1906_v33 = vpop.f32.mrb[18].mxu0  ;;  %v3421_v28 = vrot.slane %v4059_v27, %v1819_v23 }
 0x2bc   : > { %1909 = vst [vmem:[%s5593_s5] sm:$0x3] %v1904_v26  ;;  %v4592_v34 = vpop.f32.mrb[19].mxu0  ;;  %v3412_v33 = vrot.slane %v4059_v27, %v1810_v31 }
 0x2d9   : > { %v4426_v36 = vpop.f32.mrb[20].mxu0 }
 0x2da   : > { %v4427_v37 = vpop.f32.mrb[21].mxu0 }
 0x2db   : > { %v4428_v38 = vadd.f32 %v4427_v37, %v4426_v36  ;;  %v4429_v39 = vpop.f32.mrb[22].mxu0 }
 0x2dc   : > { %v4430_v40 = vpop.f32.mrb[23].mxu0 }
 0x2dd   : > { %v3138_v41 = vadd.f32 %v4428_v38, %v5567_v50 }
 0x2df   : > { %v3178_v25 = vadd.f32 %v4450_v8, %v3138_v41 }
 0x2f9   : > { %v4470_v49 = vpop.f32.mrb[24].mxu0 }
 0x2fa   : > { %v4471_v50 = vpop.f32.mrb[25].mxu0 }
 0x2fb   : > { %v4472_v13 = vadd.f32 %v4471_v50, %v4470_v49  ;;  %v4473_v51 = vpop.f32.mrb[26].mxu0 }
 0x2fc   : > { %v4474_v52 = vpop.f32.mrb[27].mxu0 }
 0x2fd   : > { %v3218_v53 = vadd.f32 %v4472_v13, %v3178_v25 }
 0x2ff   : > { %v3258_v35 = vadd.f32 %v4494_v15, %v3218_v53 }
 0x319   : > { %v4514_v54 = vpop.f32.mrb[28].mxu0 }
 0x31a   : > { %v4515_v55 = vpop.f32.mrb[29].mxu0 }
 0x31b   : > { %v4516_v56 = vadd.f32 %v4515_v55, %v4514_v54  ;;  %v4517_v58 = vpop.f32.mrb[30].mxu0 }
 0x31c   : > { %v4518_v59 = vpop.f32.mrb[31].mxu0 }
 0x31d   : > { %v3298_v60 = vadd.f32 %v4516_v56, %v3258_v35 }
 0x31f   : > { %v3338_v61 = vadd.f32 %v4538_v20, %v3298_v60 }
 0x339   : > { %v4558_v63 = vpop.f32.mrb[32].mxu0 }
 0x33a   : > { %v4559_v0 = vpop.f32.mrb[33].mxu0 }
 0x33b   : > { %v4560_v1 = vadd.f32 %v4559_v0, %v4558_v63  ;;  %v4561_v2 = vpop.f32.mrb[34].mxu0 }
 0x33c   : > { %v4562_v62 = vpop.f32.mrb[35].mxu0 }
 0x33d   : > { %v3378_v57 = vadd.f32 %v4560_v1, %v3338_v61 }
 0x33f   : > { %v3383_v3 = vsel %vm1780_vm1, %v3378_v57, 0.0 }
 0x340   : > { %v3384_v4 = vrot.slane %v3383_v3, 4 }
 0x342   : > { %v3385_v5 = vadd.f32 %v3384_v4, %v3383_v3 }
 0x344   : > { %v3386_v6 = vrot.slane %v3385_v5, 2 }
 0x346   : > { %v3387_v7 = vadd.f32 %v3386_v6, %v3385_v5 }
 0x348   : > { %v3388_v8 = vrot.slane %v3387_v7, 1 }
 0x34a   : > { %v3389_v9 = vadd.f32 %v3388_v8, %v3387_v7 }
 0x34c   : > { %v3390_v10 = vmul.f32 0.5, %v3389_v9 }
 0x34e   : > { %v3391_v11 = vsub.f32 %v3378_v57, %v3390_v10 }
 0x350   : > { %v3392_v12 = vmul.f32 %v3391_v11, %v3391_v11 }
 0x352   : > { %v3393_v14 = vsel %vm1780_vm1, %v3392_v12, 0.0 }
 0x353   : > { %v3394_v15 = vrot.slane %v3393_v14, 4 }
 0x355   : > { %v3395_v16 = vadd.f32 %v3394_v15, %v3393_v14 }
 0x357   : > { %v3396_v17 = vrot.slane %v3395_v16, 2 }
 0x359   : > { %v3397_v18 = vadd.f32 %v3396_v17, %v3395_v16 }
 0x35b   : > { %v3398_v19 = vrot.slane %v3397_v18, 1 }
 0x35d   : > { %v3399_v20 = vadd.f32 %v3398_v19, %v3397_v18 }
 0x35f   : > { %v3400_v21 = vmul.f32 0.5, %v3399_v20 }
 0x361   : > { %v3401_v22 = vadd.f32 1e-05, %v3400_v21 }
 0x363   : > { %4944 = vrsqrt.f32 %v3401_v22 }
 0x36d   : > { %v4945_v24 = vpop.eup %4944 }
 0x36e   : > { %v3403_v26 = vmul.f32 %v4945_v24, %v4059_v27 }
 0x370   : > { %v3407_v32 = vrot.slane %v3403_v26, %v1805_v29 }
 0x372   : > { %v3408_v34 = vmul.f32 %v3407_v32, %v3391_v11 }
 0x374   : > { %v3413_v36 = vadd.f32 %v3412_v33, %v3408_v34 }
 0x376   : > { %vm3414_vm3 = vcmp.gt.f32.partialorder %v3413_v36, 0.0  ;;  %v3415_v37 = vmul.f32 0.1, %v3413_v36 }
 0x378   : > { %v3416_v38 = vsel %vm3414_vm3, %v3413_v36, %v3415_v37 }
 0x379   : > { %v3417_v39 = vpack.c.bf16 %v3416_v38, %v3416_v38 }
 0x37b   : > { %4610 = vmatmul.mubr.bf16.vlgmr.msra.gmra.mrb[32].mxu1 %v3417_v39 }
 0x44e   : > { %v3504_v40 = vpop.f32.mrb[32].mxu1 }
 0x44f   : > { %v3505_v41 = vadd.f32 %v3504_v40, %v3421_v28  ;;  %v4611_v25 = vpop.f32.mrb[33].mxu1 }
 0x450   : > { %v3507_v42 = vpop.f32.mrb[34].mxu1 }
 0x451   : > { %3510 = vst [vmem:[%s5593_s5 + $0x2] sm:$0x3] %v3505_v41  ;;  %v4612_v43 = vpop.f32.mrb[35].mxu1 }
 0x452 PF: > { %p17_p11 = scmp.ge.s32.totalorder %s5098_s20, 4   ;;  %s5646_s15 = smov %s5036_s16 }
 0x453   : > { %s5647_s16 = smov %s5040_s17  ;;  %s5648_s17 = smov %s5108_s23 }
 0x454   : > { %s5649_s18 = smov %s5098_s20  ;;  %19 = sbr.rel (!%p17_p11) target bundleno = 5 (0x5), region = 99 }
 0x45b   :  { %3533 = vsyncpa [#allocation3], 1 }
 0x45c   :  { %3535 = vsyncpa [#allocation3 + $0x1], 1 }
 0x45d   :  { %3536 = vsyncpa [#allocation5], 1 }
 0x45e   :  { %3538 = vsyncpa [#allocation5 + $0x1], 1 }

</bundles_post_ra>
